<compile_context>
chip_gen: v7x
topology: tpu7x:2x2x1
jax: 0.10.0
libtpu: 0.0.40
codegen_flags: <defaults>
</compile_context>

<pallas_src>
import functools
import math

import jax
import jax.numpy as jnp
from jax import lax
from jax.experimental import pallas as pl
from jax.experimental.pallas import tpu as pltpu


# -----------------------------------------------------------------------------
# Kernel 1: backbone 1x1 conv (VPU FMAs) + ReLU + input_proj (MXU) -> bf16 memory
# -----------------------------------------------------------------------------
def _backbone_proj_kernel(x_ref, wb_ref, bb_ref, wp_ref, bp_ref, o_ref):
    x = x_ref[...]                                   # (tm, Cin) f32, Cin tiny (RGB)
    wb = wb_ref[...]                                 # (Cin, C) f32
    # Backbone 1x1 conv as VPU broadcast FMAs: an MXU pass with K=Cin(=3) is >95% pad.
    feat = jnp.zeros((x.shape[0], wb.shape[1]), jnp.float32) + bb_ref[...]
    for i in range(x.shape[1]):                      # static unroll over input channels
        feat = feat + x[:, i:i + 1] * wb[i:i + 1, :]
    feat = jnp.maximum(feat, 0.0)                    # backbone conv + ReLU
    proj = (jnp.dot(feat.astype(jnp.bfloat16), wp_ref[...],
                    preferred_element_type=jnp.float32) + bp_ref[...])
    o_ref[...] = proj.astype(o_ref.dtype)            # bf16 memory for the decoder


def backbone_and_proj(x_flat, wb, bb, wp, bp, *, row_tile=512):
    n, cin = x_flat.shape
    c = wb.shape[1]
    d = wp.shape[1]
    tm = min(row_tile, n)
    return pl.pallas_call(
        _backbone_proj_kernel,
        out_shape=jax.ShapeDtypeStruct((n, d), jnp.bfloat16),
        grid=(pl.cdiv(n, tm),),
        in_specs=[
            pl.BlockSpec((tm, cin), lambda i: (i, 0)),
            pl.BlockSpec((cin, c), lambda i: (0, 0)),
            pl.BlockSpec((1, c), lambda i: (0, 0)),
            pl.BlockSpec((c, d), lambda i: (0, 0)),
            pl.BlockSpec((1, d), lambda i: (0, 0)),
        ],
        out_specs=pl.BlockSpec((tm, d), lambda i: (i, 0)),
        compiler_params=pltpu.CompilerParams(
            dimension_semantics=("parallel",),
            vmem_limit_bytes=32 * 1024 * 1024),
    )(x_flat, wb, bb, wp, bp)


# -----------------------------------------------------------------------------
# Kernel 2: fused decoder stack.  grid=(B, L): batch parallel, layers carried in VMEM.
# -----------------------------------------------------------------------------
def _decoder_stack_kernel(qe_ref, memv_ref, memk_ref, bias_ref,
                          wq_ref, bq_ref, wk_ref, bk_ref, wv_ref, bv_ref,
                          wo_ref, bo_ref, hs_ref, tgt_ref):
    bf16 = jnp.bfloat16

    @pl.when(pl.program_id(1) == 0)                  # new batch item -> reset carry
    def _():
        tgt_ref[...] = jnp.zeros_like(tgt_ref)

    tgt = tgt_ref[...]                               # (Q, D) f32 carry
    qin = (tgt + qe_ref[...]).astype(bf16)           # DETR: queries = tgt + query_embed

    def proj(x_bf16, w_ref, b_ref):                  # 2-D matmul, bf16 in / f32 acc
        return (jnp.dot(x_bf16, w_ref[...], preferred_element_type=jnp.float32)
                + b_ref[...])

    q = proj(qin, wq_ref, bq_ref)                    # (Q, D); 1/sqrt(D) folded in wq/bq
    k = proj(memk_ref[...], wk_ref, bk_ref)          # (S, D); keys see memory + pos
    v = proj(memv_ref[...], wv_ref, bv_ref)          # (S, D); values see memory only

    # scores: contract last axes directly (no K transpose); bf16 operands, f32 acc
    s = lax.dot_general(q.astype(bf16), k.astype(bf16), (((1,), (1,)), ((), ())),
                        preferred_element_type=jnp.float32)            # (Q, S)
    s = s + bias_ref[...]                            # precomputed -1e9 padding bias, f32
    p = jnp.exp(s - jnp.max(s, axis=-1, keepdims=True))
    denom = jnp.sum(p, axis=-1, keepdims=True)
    attn = jnp.dot(p.astype(bf16), v.astype(bf16),
                   preferred_element_type=jnp.float32)                 # (Q, D)
    attn = attn * pl.reciprocal(denom, approx=True)  # EUP reciprocal (free slot)

    new_tgt = tgt + proj(attn.astype(bf16), wo_ref, bo_ref)
    tgt_ref[...] = new_tgt
    hs_ref[...] = new_tgt.astype(hs_ref.dtype)


def decoder_stack(query_embed, mem_v, mem_k, mask_bias,
                  wq, bq, wk, bk, wv, bv, wo, bo, *, num_layers_out):
    L, D, _ = wq.shape
    B, S, _ = mem_v.shape
    Q = query_embed.shape[0]

    w_spec = pl.BlockSpec((None, D, D), lambda b, l: (l, 0, 0))
    b_spec = pl.BlockSpec((None, 1, D), lambda b, l: (l, 0, 0))
    mem_spec = pl.BlockSpec((None, S, D), lambda b, l: (b, 0, 0))
    if num_layers_out == L:                          # aux_loss: keep every layer
        out_map = lambda b, l: (l, b, 0, 0)
    else:                                            # inference: revisit one block ->
        out_map = lambda b, l: (0, b, 0, 0)          # only the last layer hits HBM

    # TODO(synk): at real S*D mark query_embed / memory / mask specs single-buffered
    # (pipeline_mode=pl.Buffered(1)) and tile S flash-style to bound VMEM on v7x.
    return pl.pallas_call(
        _decoder_stack_kernel,
        out_shape=jax.ShapeDtypeStruct((num_layers_out, B, Q, D), jnp.bfloat16),
        grid=(B, L),
        in_specs=[
            pl.BlockSpec((Q, D), lambda b, l: (0, 0)),           # query_embed (f32)
            mem_spec,                                            # values source (bf16)
            mem_spec,                                            # keys source   (bf16)
            pl.BlockSpec((None, 1, S), lambda b, l: (b, 0, 0)),  # additive mask bias
            w_spec, b_spec,                                      # wq, bq
            w_spec, b_spec,                                      # wk, bk
            w_spec, b_spec,                                      # wv, bv
            w_spec, b_spec,                                      # wo, bo
        ],
        out_specs=pl.BlockSpec((None, None, Q, D), out_map),
        scratch_shapes=[pltpu.VMEM((Q, D), jnp.float32)],
        compiler_params=pltpu.CompilerParams(
            dimension_semantics=("parallel", "arbitrary"),
            vmem_limit_bytes=48 * 1024 * 1024),
    )(query_embed, mem_v, mem_k, mask_bias, wq, bq, wk, bk, wv, bv, wo, bo)


# -----------------------------------------------------------------------------
# Kernel 3: fused heads (class linear + bbox MLP3 + sigmoid + graph MLP3),
#           row-tiled, single 128-lane-dense output slab.
# -----------------------------------------------------------------------------
def _heads_kernel(hs_ref, w1_ref, b1_ref, w2_ref, b2_ref, wc_ref, w3_ref, bh_ref,
                  o_ref, *, nc1, nbox):
    bf16 = jnp.bfloat16
    hs = hs_ref[...]                                                     # (tm, D) bf16
    h1 = jnp.maximum(jnp.dot(hs, w1_ref[...], preferred_element_type=jnp.float32)
                     + b1_ref[...], 0.0)                                 # (tm, 2D)
    # Block-diagonal second layer (kept fused: D < 128 here; split into two dots for
    # real D >= 128 to avoid multiplying zeros).
    h2 = jnp.maximum(jnp.dot(h1.astype(bf16), w2_ref[...],
                             preferred_element_type=jnp.float32) + b2_ref[...], 0.0)
    slab = (jnp.dot(hs, wc_ref[...], preferred_element_type=jnp.float32)
            + jnp.dot(h2.astype(bf16), w3_ref[...], preferred_element_type=jnp.float32)
            + bh_ref[...])                                               # (tm, OUT_PAD)
    col = lax.broadcasted_iota(jnp.int32, slab.shape, 1)
    is_box = (col >= nc1) & (col < nc1 + nbox)
    slab = jnp.where(is_box, jax.nn.sigmoid(slab), slab)                 # sigmoid on bbox
    o_ref[...] = slab.astype(o_ref.dtype)


def fused_heads(hs_flat, packed, *, nc1, out_pad, row_tile=256):
    n, d = hs_flat.shape
    tm = min(row_tile, n)
    kernel = functools.partial(_heads_kernel, nc1=nc1, nbox=4)
    full = lambda s: pl.BlockSpec(s, lambda i: (0, 0))
    return pl.pallas_call(
        kernel,
        out_shape=jax.ShapeDtypeStruct((n, out_pad), jnp.float32),
        grid=(pl.cdiv(n, tm),),
        in_specs=[
            pl.BlockSpec((tm, d), lambda i: (i, 0)),
            full((d, 2 * d)), full((1, 2 * d)),
            full((2 * d, 2 * d)), full((1, 2 * d)),
            full((d, out_pad)), full((2 * d, out_pad)), full((1, out_pad)),
        ],
        out_specs=pl.BlockSpec((tm, out_pad), lambda i: (i, 0)),
        compiler_params=pltpu.CompilerParams(
            dimension_semantics=("parallel",),
            vmem_limit_bytes=32 * 1024 * 1024),
    )(hs_flat, packed["w1"], packed["b1"], packed["w2"], packed["b2"],
      packed["wc"], packed["w3"], packed["bh"])


# -----------------------------------------------------------------------------
# Plain-JAX glue
# -----------------------------------------------------------------------------
def position_embedding_sine(mask, num_pos_feats, temperature=10000.0):
    """DETR PositionEmbeddingSine, NHWC output: [B, H, W, 2*num_pos_feats]."""
    not_mask = (~mask).astype(jnp.float32)
    y_embed = jnp.cumsum(not_mask, axis=1)
    x_embed = jnp.cumsum(not_mask, axis=2)
    eps = 1e-6
    scale = 2.0 * jnp.pi
    y_embed = y_embed / (y_embed[:, -1:, :] + eps) * scale
    x_embed = x_embed / (x_embed[:, :, -1:] + eps) * scale
    dim_t = jnp.arange(num_pos_feats, dtype=jnp.float32)
    dim_t = temperature ** (2.0 * jnp.floor(dim_t / 2.0) / num_pos_feats)
    pos_x = x_embed[..., None] / dim_t
    pos_y = y_embed[..., None] / dim_t
    pos_x = jnp.stack([jnp.sin(pos_x[..., 0::2]), jnp.cos(pos_x[..., 1::2])], axis=4)
    pos_x = pos_x.reshape(*pos_x.shape[:3], -1)
    pos_y = jnp.stack([jnp.sin(pos_y[..., 0::2]), jnp.cos(pos_y[..., 1::2])], axis=4)
    pos_y = pos_y.reshape(*pos_y.shape[:3], -1)
    return jnp.concatenate([pos_y, pos_x], axis=-1)


def _out_pad_for(cfg):
    total = (cfg["num_classes"] + 1) + 4 + cfg["graph_dim"]
    return max(128, ((total + 127) // 128) * 128)


# -----------------------------------------------------------------------------
# GRAPHDETR forward
# -----------------------------------------------------------------------------
def graph_detr_forward(prep, samples_nchw, pad_mask, cfg, aux_loss=False):
    B = samples_nchw.shape[0]
    D = cfg["hidden_dim"]
    Q = cfg["num_queries"]
    L = cfg["num_decoder_layers"]
    NC1 = cfg["num_classes"] + 1
    G = cfg["graph_dim"]
    out_pad = _out_pad_for(cfg)

    # ---- backbone stand-in: stride-2 downsample, fused conv+ReLU+input_proj kernel ----
    x = samples_nchw[:, :, ::2, ::2]                  # [B, 3, H/2, W/2]
    x = jnp.transpose(x, (0, 2, 3, 1))                # NCHW -> NHWC
    _, Hh, Wh, Cin = x.shape
    mask_ds = pad_mask[:, ::2, ::2]                   # features[-1].mask
    S = Hh * Wh
    pos = position_embedding_sine(mask_ds, num_pos_feats=D // 2)   # [B, Hh, Wh, D] f32
    mem_flat = backbone_and_proj(
        x.reshape(B * S, Cin),
        prep["backbone_w"], prep["backbone_b"],
        prep["input_proj_w"], prep["input_proj_b"])                # (B*S, D) bf16
    memory = mem_flat.reshape(B, S, D)                             # value source
    mem_key = (memory.astype(jnp.float32)
               + pos.reshape(B, S, D)).astype(jnp.bfloat16)        # key source (DETR)
    mask_bias = mask_ds.reshape(B, 1, S).astype(jnp.float32) * (-1e9)

    # ---- transformer stand-in: fused cross-attention decoder stack ----
    # TODO(synk): encoder self-attention, decoder self-attention, FFN, LayerNorm and
    # multi-head split of the injected DETR transformer are not reproduced; only the
    # cross-attention hot path is.
    hs = decoder_stack(prep["query_embed"], memory, mem_key, mask_bias,
                       prep["wq"], prep["bq"], prep["wk"], prep["bk"],
                       prep["wv"], prep["bv"], prep["wo"], prep["bo"],
                       num_layers_out=L if aux_loss else 1)
    nL = hs.shape[0]                                  # L if aux_loss else 1

    # ---- fused heads on the emitted layers only ----
    slab = fused_heads(hs.reshape(nL * B * Q, D), prep["heads"],
                       nc1=NC1, out_pad=out_pad).reshape(nL, B, Q, out_pad)
    cls = slab[..., :NC1]
    box = slab[..., NC1:NC1 + 4]
    grf = slab[..., NC1 + 4:NC1 + 4 + G]

    out = {"pred_logits": cls[-1], "pred_boxes": box[-1], "pred_graph": grf[-1]}
    if aux_loss:
        out["aux_outputs"] = [
            {"pred_logits": a, "pred_boxes": b, "pred_graph": c}
            for a, b, c in zip(cls[:-1], box[:-1], grf[:-1])
        ]
    return out


# -----------------------------------------------------------------------------
# Deterministic parameter init + one-time (outside-jit) kernel-ready packing
# -----------------------------------------------------------------------------
def init_params(key, cfg):
    D, L = cfg["hidden_dim"], cfg["num_decoder_layers"]
    C = cfg["num_channels"]
    keys = iter(jax.random.split(key, 64))

    def p(shape, scale=0.02):
        return scale * jax.random.normal(next(keys), shape, jnp.float32)

    return {
        "backbone_w": p((3, C)), "backbone_b": p((C,)),
        "input_proj_w": p((C, D)), "input_proj_b": p((D,)),
        "query_embed": p((cfg["num_queries"], D), scale=1.0),
        "wq": p((L, D, D)), "bq": p((L, D)),
        "wk": p((L, D, D)), "bk": p((L, D)),
        "wv": p((L, D, D)), "bv": p((L, D)),
        "wo": p((L, D, D)), "bo": p((L, D)),
        "class_w": p((D, cfg["num_classes"] + 1)), "class_b": p((cfg["num_classes"] + 1,)),
        "bbox": {
            "w1": p((D, D)), "b1": p((D,)),
            "w2": p((D, D)), "b2": p((D,)),
            "w3": p((D, 4)), "b3": p((4,)),
        },
        "graph": {
            "w1": p((D, D)), "b1": p((D,)),
            "w2": p((D, D)), "b2": p((D,)),
            "w3": p((D, cfg["graph_dim"])), "b3": p((cfg["graph_dim"],)),
        },
    }


def prepare_params(params, cfg):
    """One-time packing/casting (run OUTSIDE the jitted forward): bf16 matmul weights,
    1/sqrt(D) folded into the query projection, head weights packed into a single
    128-lane-dense output slab (concat / block-diag / column-placed)."""
    D = cfg["hidden_dim"]
    NC1 = cfg["num_classes"] + 1
    G = cfg["graph_dim"]
    out_pad = _out_pad_for(cfg)
    f32, bf16 = jnp.float32, jnp.bfloat16
    scale = 1.0 / math.sqrt(D)

    bbox, graph = params["bbox"], params["graph"]
    w1 = jnp.concatenate([bbox["w1"], graph["w1"]], axis=1)              # (D, 2D)
    b1 = jnp.concatenate([bbox["b1"], graph["b1"]])[None, :]             # (1, 2D)
    w2 = (jnp.zeros((2 * D, 2 * D), f32)
          .at[:D, :D].set(bbox["w2"]).at[D:, D:].set(graph["w2"]))       # block-diag
    b2 = jnp.concatenate([bbox["b2"], graph["b2"]])[None, :]
    wc = jnp.zeros((D, out_pad), f32).at[:, :NC1].set(params["class_w"])
    w3 = (jnp.zeros((2 * D, out_pad), f32)
          .at[:D, NC1:NC1 + 4].set(bbox["w3"])
          .at[D:, NC1 + 4:NC1 + 4 + G].set(graph["w3"]))
    bh = (jnp.zeros((1, out_pad), f32)
          .at[0, :NC1].set(params["class_b"])
          .at[0, NC1:NC1 + 4].set(bbox["b3"])
          .at[0, NC1 + 4:NC1 + 4 + G].set(graph["b3"]))

    return {
        "backbone_w": params["backbone_w"].astype(f32),
        "backbone_b": params["backbone_b"].reshape(1, -1).astype(f32),
        "input_proj_w": params["input_proj_w"].astype(bf16),
        "input_proj_b": params["input_proj_b"].reshape(1, -1).astype(f32),
        "query_embed": params["query_embed"].astype(f32),
        "wq": (params["wq"] * scale).astype(bf16),
        "bq": (params["bq"] * scale)[:, None, :].astype(f32),
        "wk": params["wk"].astype(bf16), "bk": params["bk"][:, None, :].astype(f32),
        "wv": params["wv"].astype(bf16), "bv": params["bv"][:, None, :].astype(f32),
        "wo": params["wo"].astype(bf16), "bo": params["bo"][:, None, :].astype(f32),
        "heads": {
            "w1": w1.astype(bf16), "b1": b1.astype(f32),
            "w2": w2.astype(bf16), "b2": b2.astype(f32),
            "wc": wc.astype(bf16), "w3": w3.astype(bf16), "bh": bh.astype(f32),
        },
    }


# -----------------------------------------------------------------------------
if __name__ == "__main__":
    cfg = dict(
        hidden_dim=32,
        num_queries=8,
        num_classes=6,
        graph_dim=16,
        num_channels=4,
        num_decoder_layers=3,
    )

    key = jax.random.PRNGKey(0)
    k_param, k_x = jax.random.split(key)
    params = init_params(k_param, cfg)
    prep = prepare_params(params, cfg)        # one-time packing, outside the jit

    # samples.tensor: [B, 3, H, W] (NCHW, like torch); samples.mask: [B, H, W] bool.
    samples = jax.random.normal(k_x, (2, 3, 16, 16), jnp.float32)
    pad_mask = jnp.zeros((2, 16, 16), dtype=bool)

    fwd = jax.jit(functools.partial(graph_detr_forward, cfg=cfg, aux_loss=False))
    out = fwd(prep, samples, pad_mask)
    jax.block_until_ready(out)

    assert out["pred_logits"].shape == (2, cfg["num_queries"], cfg["num_classes"] + 1)
    assert out["pred_boxes"].shape == (2, cfg["num_queries"], 4)
    assert out["pred_graph"].shape == (2, cfg["num_queries"], cfg["graph_dim"])
    assert bool(jnp.all(out["pred_boxes"] >= 0.0) & jnp.all(out["pred_boxes"] <= 1.0))
    print("KERNEL_OK")
</pallas_src>

<mosaic_0001>
module attributes {stable_mosaic.version = 11 : i64} {
  func.func @_backbone_proj_kernel(%arg0: i32, %arg1: memref<128x3xf32, #tpu.memory_space<vmem>>, %arg2: memref<3x4xf32, #tpu.memory_space<vmem>>, %arg3: memref<1x4xf32, #tpu.memory_space<vmem>>, %arg4: memref<4x32xbf16, #tpu.memory_space<vmem>>, %arg5: memref<1x32xf32, #tpu.memory_space<vmem>>, %arg6: memref<128x32xbf16, #tpu.memory_space<vmem>>) attributes {dimension_semantics = [#tpu.dimension_semantics<parallel>], iteration_bounds = array<i64: 1>, scalar_prefetch = 0 : i64, scratch_operands = 0 : i64, tpu.core_type = #tpu.core_type<tc>, window_params = [{transform_indices = @transform_0, window_bounds = array<i64: 128, 3>}, {pipeline_mode = #tpu.pipeline_mode<synchronous>, transform_indices = @transform_1, window_bounds = array<i64: 3, 4>}, {pipeline_mode = #tpu.pipeline_mode<synchronous>, transform_indices = @transform_2, window_bounds = array<i64: 1, 4>}, {pipeline_mode = #tpu.pipeline_mode<synchronous>, transform_indices = @transform_3, window_bounds = array<i64: 4, 32>}, {pipeline_mode = #tpu.pipeline_mode<synchronous>, transform_indices = @transform_4, window_bounds = array<i64: 1, 32>}, {transform_indices = @transform_5, window_bounds = array<i64: 128, 32>}]} {
    %c0 = arith.constant 0 : index
    %c0_0 = arith.constant 0 : index
    %0 = vector.load %arg1[%c0, %c0_0] : memref<128x3xf32, #tpu.memory_space<vmem>>, vector<128x3xf32>
    %c0_1 = arith.constant 0 : index
    %c0_2 = arith.constant 0 : index
    %1 = vector.load %arg2[%c0_1, %c0_2] : memref<3x4xf32, #tpu.memory_space<vmem>>, vector<3x4xf32>
    %cst = arith.constant 0.000000e+00 : f32
    %2 = vector.broadcast %cst : f32 to vector<128x4xf32>
    %c0_3 = arith.constant 0 : index
    %c0_4 = arith.constant 0 : index
    %3 = vector.load %arg3[%c0_3, %c0_4] : memref<1x4xf32, #tpu.memory_space<vmem>>, vector<1x4xf32>
    %4 = vector.broadcast %3 : vector<1x4xf32> to vector<128x4xf32>
    %5 = arith.addf %2, %4 : vector<128x4xf32>
    %6 = vector.extract_strided_slice %0 {offsets = [0, 0], sizes = [128, 1], strides = [1, 1]} : vector<128x3xf32> to vector<128x1xf32>
    %7 = vector.extract_strided_slice %1 {offsets = [0, 0], sizes = [1, 4], strides = [1, 1]} : vector<3x4xf32> to vector<1x4xf32>
    %8 = vector.broadcast %6 : vector<128x1xf32> to vector<128x4xf32>
    %9 = vector.broadcast %7 : vector<1x4xf32> to vector<128x4xf32>
    %10 = arith.mulf %8, %9 : vector<128x4xf32>
    %11 = arith.addf %5, %10 : vector<128x4xf32>
    %12 = vector.extract_strided_slice %0 {offsets = [0, 1], sizes = [128, 1], strides = [1, 1]} : vector<128x3xf32> to vector<128x1xf32>
    %13 = vector.extract_strided_slice %1 {offsets = [1, 0], sizes = [1, 4], strides = [1, 1]} : vector<3x4xf32> to vector<1x4xf32>
    %14 = vector.broadcast %12 : vector<128x1xf32> to vector<128x4xf32>
    %15 = vector.broadcast %13 : vector<1x4xf32> to vector<128x4xf32>
    %16 = arith.mulf %14, %15 : vector<128x4xf32>
    %17 = arith.addf %11, %16 : vector<128x4xf32>
    %18 = vector.extract_strided_slice %0 {offsets = [0, 2], sizes = [128, 1], strides = [1, 1]} : vector<128x3xf32> to vector<128x1xf32>
    %19 = vector.extract_strided_slice %1 {offsets = [2, 0], sizes = [1, 4], strides = [1, 1]} : vector<3x4xf32> to vector<1x4xf32>
    %20 = vector.broadcast %18 : vector<128x1xf32> to vector<128x4xf32>
    %21 = vector.broadcast %19 : vector<1x4xf32> to vector<128x4xf32>
    %22 = arith.mulf %20, %21 : vector<128x4xf32>
    %23 = arith.addf %17, %22 : vector<128x4xf32>
    %cst_5 = arith.constant 0.000000e+00 : f32
    %24 = vector.broadcast %cst_5 : f32 to vector<128x4xf32>
    %25 = arith.maximumf %23, %24 : vector<128x4xf32>
    %26 = arith.truncf %25 : vector<128x4xf32> to vector<128x4xbf16>
    %c0_6 = arith.constant 0 : index
    %c0_7 = arith.constant 0 : index
    %27 = vector.load %arg4[%c0_6, %c0_7] : memref<4x32xbf16, #tpu.memory_space<vmem>>, vector<4x32xbf16>
    %cst_8 = arith.constant dense<0.000000e+00> : vector<128x32xf32>
    %28 = tpu.matmul %26, %27, %cst_8 {dimension_numbers = #tpu.dot_dimension_numbers<[1], [0], [0], [1], [0, 0, 1, 1], [], []>} : vector<128x4xbf16>, vector<4x32xbf16>, vector<128x32xf32> -> vector<128x32xf32>
    %c0_9 = arith.constant 0 : index
    %c0_10 = arith.constant 0 : index
    %29 = vector.load %arg5[%c0_9, %c0_10] : memref<1x32xf32, #tpu.memory_space<vmem>>, vector<1x32xf32>
    %30 = vector.broadcast %29 : vector<1x32xf32> to vector<128x32xf32>
    %31 = arith.addf %28, %30 : vector<128x32xf32>
    %32 = arith.truncf %31 : vector<128x32xf32> to vector<128x32xbf16>
    %c0_11 = arith.constant 0 : index
    %c0_12 = arith.constant 0 : index
    %33 = vector.load %arg6[%c0_11, %c0_12] : memref<128x32xbf16, #tpu.memory_space<vmem>>, vector<128x32xbf16>
    tpu.vector_store %arg6[%c0_11, %c0_12], %32 {strides = array<i32>} : memref<128x32xbf16, #tpu.memory_space<vmem>>, vector<128x32xbf16>,
    return
  }
  func.func @transform_0(%arg0: i32) -> (i32, i32) {
    %c0_i32 = arith.constant 0 : i32
    %c0_i32_0 = arith.constant 0 : i32
    return %arg0, %c0_i32 : i32, i32
  }
  func.func @transform_1(%arg0: i32) -> (i32, i32) {
    %c0_i32 = arith.constant 0 : i32
    %c0_i32_0 = arith.constant 0 : i32
    %c0_i32_1 = arith.constant 0 : i32
    return %c0_i32, %c0_i32_0 : i32, i32
  }
  func.func @transform_2(%arg0: i32) -> (i32, i32) {
    %c0_i32 = arith.constant 0 : i32
    %c0_i32_0 = arith.constant 0 : i32
    %c0_i32_1 = arith.constant 0 : i32
    return %c0_i32, %c0_i32_0 : i32, i32
  }
  func.func @transform_3(%arg0: i32) -> (i32, i32) {
    %c0_i32 = arith.constant 0 : i32
    %c0_i32_0 = arith.constant 0 : i32
    %c0_i32_1 = arith.constant 0 : i32
    return %c0_i32, %c0_i32_0 : i32, i32
  }
  func.func @transform_4(%arg0: i32) -> (i32, i32) {
    %c0_i32 = arith.constant 0 : i32
    %c0_i32_0 = arith.constant 0 : i32
    %c0_i32_1 = arith.constant 0 : i32
    return %c0_i32, %c0_i32_0 : i32, i32
  }
  func.func @transform_5(%arg0: i32) -> (i32, i32) {
    %c0_i32 = arith.constant 0 : i32
    %c0_i32_0 = arith.constant 0 : i32
    return %arg0, %c0_i32 : i32, i32
  }
}

module attributes {stable_mosaic.version = 11 : i64} {
  func.func @_decoder_stack_kernel(%arg0: i32, %arg1: i32, %arg2: memref<8x32xf32, #tpu.memory_space<vmem>>, %arg3: memref<1x64x32xbf16, #tpu.memory_space<vmem>>, %arg4: memref<1x64x32xbf16, #tpu.memory_space<vmem>>, %arg5: memref<1x1x64xf32, #tpu.memory_space<vmem>>, %arg6: memref<1x32x32xbf16, #tpu.memory_space<vmem>>, %arg7: memref<1x1x32xf32, #tpu.memory_space<vmem>>, %arg8: memref<1x32x32xbf16, #tpu.memory_space<vmem>>, %arg9: memref<1x1x32xf32, #tpu.memory_space<vmem>>, %arg10: memref<1x32x32xbf16, #tpu.memory_space<vmem>>, %arg11: memref<1x1x32xf32, #tpu.memory_space<vmem>>, %arg12: memref<1x32x32xbf16, #tpu.memory_space<vmem>>, %arg13: memref<1x1x32xf32, #tpu.memory_space<vmem>>, %arg14: memref<1x1x8x32xbf16, #tpu.memory_space<vmem>>, %arg15: memref<8x32xf32, #tpu.memory_space<vmem>>) attributes {dimension_semantics = [#tpu.dimension_semantics<parallel>, #tpu.dimension_semantics<arbitrary>], iteration_bounds = array<i64: 2, 3>, scalar_prefetch = 0 : i64, scratch_operands = 1 : i64, tpu.core_type = #tpu.core_type<tc>, window_params = [{pipeline_mode = #tpu.pipeline_mode<synchronous>, transform_indices = @transform_0, window_bounds = array<i64: 8, 32>}, {transform_indices = @transform_1, window_bounds = array<i64: 1, 64, 32>}, {transform_indices = @transform_2, window_bounds = array<i64: 1, 64, 32>}, {transform_indices = @transform_3, window_bounds = array<i64: 1, 1, 64>}, {transform_indices = @transform_4, window_bounds = array<i64: 1, 32, 32>}, {transform_indices = @transform_5, window_bounds = array<i64: 1, 1, 32>}, {transform_indices = @transform_6, window_bounds = array<i64: 1, 32, 32>}, {transform_indices = @transform_7, window_bounds = array<i64: 1, 1, 32>}, {transform_indices = @transform_8, window_bounds = array<i64: 1, 32, 32>}, {transform_indices = @transform_9, window_bounds = array<i64: 1, 1, 32>}, {transform_indices = @transform_10, window_bounds = array<i64: 1, 32, 32>}, {transform_indices = @transform_11, window_bounds = array<i64: 1, 1, 32>}, {transform_indices = @transform_12, window_bounds = array<i64: 1, 1, 8, 32>}]} {
    %c0_i32 = arith.constant 0 : i32
    %0 = arith.cmpi eq, %arg1, %c0_i32 : i32
    %1 = arith.extui %0 : i1 to i32
    %c0_i32_0 = arith.constant 0 : i32
    %2 = arith.cmpi ne, %1, %c0_i32_0 : i32
    scf.if %2 {
      %cst_50 = arith.constant 0.000000e+00 : f32
      %66 = vector.broadcast %cst_50 : f32 to vector<8x32xf32>
      %c0_51 = arith.constant 0 : index
      %c0_52 = arith.constant 0 : index
      %67 = vector.load %arg15[%c0_51, %c0_52] : memref<8x32xf32, #tpu.memory_space<vmem>>, vector<8x32xf32>
      tpu.vector_store %arg15[%c0_51, %c0_52], %66 {strides = array<i32>} : memref<8x32xf32, #tpu.memory_space<vmem>>, vector<8x32xf32>,
    } else {
    }
    %c0 = arith.constant 0 : index
    %c0_1 = arith.constant 0 : index
    %3 = vector.load %arg15[%c0, %c0_1] : memref<8x32xf32, #tpu.memory_space<vmem>>, vector<8x32xf32>
    %c0_2 = arith.constant 0 : index
    %c0_3 = arith.constant 0 : index
    %4 = vector.load %arg2[%c0_2, %c0_3] : memref<8x32xf32, #tpu.memory_space<vmem>>, vector<8x32xf32>
    %5 = arith.addf %3, %4 : vector<8x32xf32>
    %6 = arith.truncf %5 : vector<8x32xf32> to vector<8x32xbf16>
    %c0_4 = arith.constant 0 : index
    %c0_5 = arith.constant 0 : index
    %c0_6 = arith.constant 0 : index
    %7 = vector.load %arg6[%c0_4, %c0_5, %c0_6] : memref<1x32x32xbf16, #tpu.memory_space<vmem>>, vector<1x32x32xbf16>
    %8 = vector.shape_cast %7 : vector<1x32x32xbf16> to vector<32x32xbf16>
    %cst = arith.constant dense<0.000000e+00> : vector<8x32xf32>
    %9 = tpu.matmul %6, %8, %cst {dimension_numbers = #tpu.dot_dimension_numbers<[1], [0], [0], [1], [0, 0, 1, 1], [], []>} : vector<8x32xbf16>, vector<32x32xbf16>, vector<8x32xf32> -> vector<8x32xf32>
    %c0_7 = arith.constant 0 : index
    %c0_8 = arith.constant 0 : index
    %c0_9 = arith.constant 0 : index
    %10 = vector.load %arg7[%c0_7, %c0_8, %c0_9] : memref<1x1x32xf32, #tpu.memory_space<vmem>>, vector<1x1x32xf32>
    %11 = vector.shape_cast %10 : vector<1x1x32xf32> to vector<1x32xf32>
    %12 = vector.broadcast %11 : vector<1x32xf32> to vector<8x32xf32>
    %13 = arith.addf %9, %12 : vector<8x32xf32>
    %c0_10 = arith.constant 0 : index
    %c0_11 = arith.constant 0 : index
    %c0_12 = arith.constant 0 : index
    %14 = vector.load %arg4[%c0_10, %c0_11, %c0_12] : memref<1x64x32xbf16, #tpu.memory_space<vmem>>, vector<1x64x32xbf16>
    %15 = vector.shape_cast %14 : vector<1x64x32xbf16> to vector<64x32xbf16>
    %c0_13 = arith.constant 0 : index
    %c0_14 = arith.constant 0 : index
    %c0_15 = arith.constant 0 : index
    %16 = vector.load %arg8[%c0_13, %c0_14, %c0_15] : memref<1x32x32xbf16, #tpu.memory_space<vmem>>, vector<1x32x32xbf16>
    %17 = vector.shape_cast %16 : vector<1x32x32xbf16> to vector<32x32xbf16>
    %cst_16 = arith.constant dense<0.000000e+00> : vector<64x32xf32>
    %18 = tpu.matmul %15, %17, %cst_16 {dimension_numbers = #tpu.dot_dimension_numbers<[1], [0], [0], [1], [0, 0, 1, 1], [], []>} : vector<64x32xbf16>, vector<32x32xbf16>, vector<64x32xf32> -> vector<64x32xf32>
    %c0_17 = arith.constant 0 : index
    %c0_18 = arith.constant 0 : index
    %c0_19 = arith.constant 0 : index
    %19 = vector.load %arg9[%c0_17, %c0_18, %c0_19] : memref<1x1x32xf32, #tpu.memory_space<vmem>>, vector<1x1x32xf32>
    %20 = vector.shape_cast %19 : vector<1x1x32xf32> to vector<1x32xf32>
    %21 = vector.broadcast %20 : vector<1x32xf32> to vector<64x32xf32>
    %22 = arith.addf %18, %21 : vector<64x32xf32>
    %c0_20 = arith.constant 0 : index
    %c0_21 = arith.constant 0 : index
    %c0_22 = arith.constant 0 : index
    %23 = vector.load %arg3[%c0_20, %c0_21, %c0_22] : memref<1x64x32xbf16, #tpu.memory_space<vmem>>, vector<1x64x32xbf16>
    %24 = vector.shape_cast %23 : vector<1x64x32xbf16> to vector<64x32xbf16>
    %c0_23 = arith.constant 0 : index
    %c0_24 = arith.constant 0 : index
    %c0_25 = arith.constant 0 : index
    %25 = vector.load %arg10[%c0_23, %c0_24, %c0_25] : memref<1x32x32xbf16, #tpu.memory_space<vmem>>, vector<1x32x32xbf16>
    %26 = vector.shape_cast %25 : vector<1x32x32xbf16> to vector<32x32xbf16>
    %cst_26 = arith.constant dense<0.000000e+00> : vector<64x32xf32>
    %27 = tpu.matmul %24, %26, %cst_26 {dimension_numbers = #tpu.dot_dimension_numbers<[1], [0], [0], [1], [0, 0, 1, 1], [], []>} : vector<64x32xbf16>, vector<32x32xbf16>, vector<64x32xf32> -> vector<64x32xf32>
    %c0_27 = arith.constant 0 : index
    %c0_28 = arith.constant 0 : index
    %c0_29 = arith.constant 0 : index
    %28 = vector.load %arg11[%c0_27, %c0_28, %c0_29] : memref<1x1x32xf32, #tpu.memory_space<vmem>>, vector<1x1x32xf32>
    %29 = vector.shape_cast %28 : vector<1x1x32xf32> to vector<1x32xf32>
    %30 = vector.broadcast %29 : vector<1x32xf32> to vector<64x32xf32>
    %31 = arith.addf %27, %30 : vector<64x32xf32>
    %32 = arith.truncf %13 : vector<8x32xf32> to vector<8x32xbf16>
    %33 = arith.truncf %22 : vector<64x32xf32> to vector<64x32xbf16>
    %cst_30 = arith.constant dense<0.000000e+00> : vector<8x64xf32>
    %34 = tpu.matmul %32, %33, %cst_30 {dimension_numbers = #tpu.dot_dimension_numbers<[1], [1], [0], [0], [0, 0, 1, 0], [], []>} : vector<8x32xbf16>, vector<64x32xbf16>, vector<8x64xf32> -> vector<8x64xf32>
    %c0_31 = arith.constant 0 : index
    %c0_32 = arith.constant 0 : index
    %c0_33 = arith.constant 0 : index
    %35 = vector.load %arg5[%c0_31, %c0_32, %c0_33] : memref<1x1x64xf32, #tpu.memory_space<vmem>>, vector<1x1x64xf32>
    %36 = vector.shape_cast %35 : vector<1x1x64xf32> to vector<1x64xf32>
    %37 = vector.broadcast %36 : vector<1x64xf32> to vector<8x64xf32>
    %38 = arith.addf %34, %37 : vector<8x64xf32>
    %cst_34 = arith.constant dense<0xFF800000> : vector<8xf32>
    %39 = vector.multi_reduction <maximumf>, %38, %cst_34 [1] : vector<8x64xf32> to vector<8xf32>
    %40 = vector.shape_cast %39 : vector<8xf32> to vector<8x1xf32>
    %41 = vector.broadcast %40 : vector<8x1xf32> to vector<8x64xf32>
    %42 = arith.subf %38, %41 : vector<8x64xf32>
    %43 = math.exp %42 : vector<8x64xf32>
    %cst_35 = arith.constant dense<0.000000e+00> : vector<8xf32>
    %44 = vector.multi_reduction <add>, %43, %cst_35 [1] : vector<8x64xf32> to vector<8xf32>
    %45 = vector.shape_cast %44 : vector<8xf32> to vector<8x1xf32>
    %46 = arith.truncf %43 : vector<8x64xf32> to vector<8x64xbf16>
    %47 = arith.truncf %31 : vector<64x32xf32> to vector<64x32xbf16>
    %cst_36 = arith.constant dense<0.000000e+00> : vector<8x32xf32>
    %48 = tpu.matmul %46, %47, %cst_36 {dimension_numbers = #tpu.dot_dimension_numbers<[1], [0], [0], [1], [0, 0, 1, 1], [], []>} : vector<8x64xbf16>, vector<64x32xbf16>, vector<8x32xf32> -> vector<8x32xf32>
    %49 = tpu.reciprocal %45 {approx = true} : vector<8x1xf32> -> vector<8x1xf32>
    %50 = vector.broadcast %49 : vector<8x1xf32> to vector<8x32xf32>
    %51 = arith.mulf %48, %50 : vector<8x32xf32>
    %52 = arith.truncf %51 : vector<8x32xf32> to vector<8x32xbf16>
    %c0_37 = arith.constant 0 : index
    %c0_38 = arith.constant 0 : index
    %c0_39 = arith.constant 0 : index
    %53 = vector.load %arg12[%c0_37, %c0_38, %c0_39] : memref<1x32x32xbf16, #tpu.memory_space<vmem>>, vector<1x32x32xbf16>
    %54 = vector.shape_cast %53 : vector<1x32x32xbf16> to vector<32x32xbf16>
    %cst_40 = arith.constant dense<0.000000e+00> : vector<8x32xf32>
    %55 = tpu.matmul %52, %54, %cst_40 {dimension_numbers = #tpu.dot_dimension_numbers<[1], [0], [0], [1], [0, 0, 1, 1], [], []>} : vector<8x32xbf16>, vector<32x32xbf16>, vector<8x32xf32> -> vector<8x32xf32>
    %c0_41 = arith.constant 0 : index
    %c0_42 = arith.constant 0 : index
    %c0_43 = arith.constant 0 : index
    %56 = vector.load %arg13[%c0_41, %c0_42, %c0_43] : memref<1x1x32xf32, #tpu.memory_space<vmem>>, vector<1x1x32xf32>
    %57 = vector.shape_cast %56 : vector<1x1x32xf32> to vector<1x32xf32>
    %58 = vector.broadcast %57 : vector<1x32xf32> to vector<8x32xf32>
    %59 = arith.addf %55, %58 : vector<8x32xf32>
    %60 = arith.addf %3, %59 : vector<8x32xf32>
    %c0_44 = arith.constant 0 : index
    %c0_45 = arith.constant 0 : index
    %61 = vector.load %arg15[%c0_44, %c0_45] : memref<8x32xf32, #tpu.memory_space<vmem>>, vector<8x32xf32>
    tpu.vector_store %arg15[%c0_44, %c0_45], %60 {strides = array<i32>} : memref<8x32xf32, #tpu.memory_space<vmem>>, vector<8x32xf32>,
    %62 = arith.truncf %60 : vector<8x32xf32> to vector<8x32xbf16>
    %c0_46 = arith.constant 0 : index
    %c0_47 = arith.constant 0 : index
    %c0_48 = arith.constant 0 : index
    %c0_49 = arith.constant 0 : index
    %63 = vector.load %arg14[%c0_46, %c0_47, %c0_48, %c0_49] : memref<1x1x8x32xbf16, #tpu.memory_space<vmem>>, vector<1x1x8x32xbf16>
    %64 = vector.shape_cast %63 : vector<1x1x8x32xbf16> to vector<8x32xbf16>
    %65 = vector.shape_cast %62 : vector<8x32xbf16> to vector<1x1x8x32xbf16>
    tpu.vector_store %arg14[%c0_46, %c0_47, %c0_48, %c0_49], %65 {strides = array<i32>} : memref<1x1x8x32xbf16, #tpu.memory_space<vmem>>, vector<1x1x8x32xbf16>,
    return
  }
  func.func @transform_0(%arg0: i32, %arg1: i32) -> (i32, i32) {
    %c0_i32 = arith.constant 0 : i32
    %c0_i32_0 = arith.constant 0 : i32
    %c0_i32_1 = arith.constant 0 : i32
    return %c0_i32, %c0_i32_0 : i32, i32
  }
  func.func @transform_1(%arg0: i32, %arg1: i32) -> (i32, i32, i32) {
    %c0_i32 = arith.constant 0 : i32
    %c0_i32_0 = arith.constant 0 : i32
    %c0_i32_1 = arith.constant 0 : i32
    return %arg0, %c0_i32, %c0_i32_0 : i32, i32, i32
  }
  func.func @transform_2(%arg0: i32, %arg1: i32) -> (i32, i32, i32) {
    %c0_i32 = arith.constant 0 : i32
    %c0_i32_0 = arith.constant 0 : i32
    %c0_i32_1 = arith.constant 0 : i32
    return %arg0, %c0_i32, %c0_i32_0 : i32, i32, i32
  }
  func.func @transform_3(%arg0: i32, %arg1: i32) -> (i32, i32, i32) {
    %c0_i32 = arith.constant 0 : i32
    %c0_i32_0 = arith.constant 0 : i32
    %c0_i32_1 = arith.constant 0 : i32
    return %arg0, %c0_i32, %c0_i32_0 : i32, i32, i32
  }
  func.func @transform_4(%arg0: i32, %arg1: i32) -> (i32, i32, i32) {
    %c0_i32 = arith.constant 0 : i32
    %c0_i32_0 = arith.constant 0 : i32
    %c0_i32_1 = arith.constant 0 : i32
    return %arg1, %c0_i32, %c0_i32_0 : i32, i32, i32
  }
  func.func @transform_5(%arg0: i32, %arg1: i32) -> (i32, i32, i32) {
    %c0_i32 = arith.constant 0 : i32
    %c0_i32_0 = arith.constant 0 : i32
    %c0_i32_1 = arith.constant 0 : i32
    return %arg1, %c0_i32, %c0_i32_0 : i32, i32, i32
  }
  func.func @transform_6(%arg0: i32, %arg1: i32) -> (i32, i32, i32) {
    %c0_i32 = arith.constant 0 : i32
    %c0_i32_0 = arith.constant 0 : i32
    %c0_i32_1 = arith.constant 0 : i32
    return %arg1, %c0_i32, %c0_i32_0 : i32, i32, i32
  }
  func.func @transform_7(%arg0: i32, %arg1: i32) -> (i32, i32, i32) {
    %c0_i32 = arith.constant 0 : i32
    %c0_i32_0 = arith.constant 0 : i32
    %c0_i32_1 = arith.constant 0 : i32
    return %arg1, %c0_i32, %c0_i32_0 : i32, i32, i32
  }
  func.func @transform_8(%arg0: i32, %arg1: i32) -> (i32, i32, i32) {
    %c0_i32 = arith.constant 0 : i32
    %c0_i32_0 = arith.constant 0 : i32
    %c0_i32_1 = arith.constant 0 : i32
    return %arg1, %c0_i32, %c0_i32_0 : i32, i32, i32
  }
  func.func @transform_9(%arg0: i32, %arg1: i32) -> (i32, i32, i32) {
    %c0_i32 = arith.constant 0 : i32
    %c0_i32_0 = arith.constant 0 : i32
    %c0_i32_1 = arith.constant 0 : i32
    return %arg1, %c0_i32, %c0_i32_0 : i32, i32, i32
  }
  func.func @transform_10(%arg0: i32, %arg1: i32) -> (i32, i32, i32) {
    %c0_i32 = arith.constant 0 : i32
    %c0_i32_0 = arith.constant 0 : i32
    %c0_i32_1 = arith.constant 0 : i32
    return %arg1, %c0_i32, %c0_i32_0 : i32, i32, i32
  }
  func.func @transform_11(%arg0: i32, %arg1: i32) -> (i32, i32, i32) {
    %c0_i32 = arith.constant 0 : i32
    %c0_i32_0 = arith.constant 0 : i32
    %c0_i32_1 = arith.constant 0 : i32
    return %arg1, %c0_i32, %c0_i32_0 : i32, i32, i32
  }
  func.func @transform_12(%arg0: i32, %arg1: i32) -> (i32, i32, i32, i32) {
    %c0_i32 = arith.constant 0 : i32
    %c0_i32_0 = arith.constant 0 : i32
    %c0_i32_1 = arith.constant 0 : i32
    %c0_i32_2 = arith.constant 0 : i32
    return %c0_i32, %arg0, %c0_i32_0, %c0_i32_1 : i32, i32, i32, i32
  }
}

module attributes {stable_mosaic.version = 11 : i64} {
  func.func @_heads_kernel(%arg0: i32, %arg1: memref<16x32xbf16, #tpu.memory_space<vmem>>, %arg2: memref<32x64xbf16, #tpu.memory_space<vmem>>, %arg3: memref<1x64xf32, #tpu.memory_space<vmem>>, %arg4: memref<64x64xbf16, #tpu.memory_space<vmem>>, %arg5: memref<1x64xf32, #tpu.memory_space<vmem>>, %arg6: memref<32x128xbf16, #tpu.memory_space<vmem>>, %arg7: memref<64x128xbf16, #tpu.memory_space<vmem>>, %arg8: memref<1x128xf32, #tpu.memory_space<vmem>>, %arg9: memref<16x128xf32, #tpu.memory_space<vmem>>) attributes {dimension_semantics = [#tpu.dimension_semantics<parallel>], iteration_bounds = array<i64: 1>, scalar_prefetch = 0 : i64, scratch_operands = 0 : i64, tpu.core_type = #tpu.core_type<tc>, window_params = [{transform_indices = @transform_0, window_bounds = array<i64: 16, 32>}, {pipeline_mode = #tpu.pipeline_mode<synchronous>, transform_indices = @transform_1, window_bounds = array<i64: 32, 64>}, {pipeline_mode = #tpu.pipeline_mode<synchronous>, transform_indices = @transform_2, window_bounds = array<i64: 1, 64>}, {pipeline_mode = #tpu.pipeline_mode<synchronous>, transform_indices = @transform_3, window_bounds = array<i64: 64, 64>}, {pipeline_mode = #tpu.pipeline_mode<synchronous>, transform_indices = @transform_4, window_bounds = array<i64: 1, 64>}, {pipeline_mode = #tpu.pipeline_mode<synchronous>, transform_indices = @transform_5, window_bounds = array<i64: 32, 128>}, {pipeline_mode = #tpu.pipeline_mode<synchronous>, transform_indices = @transform_6, window_bounds = array<i64: 64, 128>}, {pipeline_mode = #tpu.pipeline_mode<synchronous>, transform_indices = @transform_7, window_bounds = array<i64: 1, 128>}, {transform_indices = @transform_8, window_bounds = array<i64: 16, 128>}]} {
    %c0 = arith.constant 0 : index
    %c0_0 = arith.constant 0 : index
    %0 = vector.load %arg1[%c0, %c0_0] : memref<16x32xbf16, #tpu.memory_space<vmem>>, vector<16x32xbf16>
    %c0_1 = arith.constant 0 : index
    %c0_2 = arith.constant 0 : index
    %1 = vector.load %arg2[%c0_1, %c0_2] : memref<32x64xbf16, #tpu.memory_space<vmem>>, vector<32x64xbf16>
    %cst = arith.constant dense<0.000000e+00> : vector<16x64xf32>
    %2 = tpu.matmul %0, %1, %cst {dimension_numbers = #tpu.dot_dimension_numbers<[1], [0], [0], [1], [0, 0, 1, 1], [], []>} : vector<16x32xbf16>, vector<32x64xbf16>, vector<16x64xf32> -> vector<16x64xf32>
    %c0_3 = arith.constant 0 : index
    %c0_4 = arith.constant 0 : index
    %3 = vector.load %arg3[%c0_3, %c0_4] : memref<1x64xf32, #tpu.memory_space<vmem>>, vector<1x64xf32>
    %4 = vector.broadcast %3 : vector<1x64xf32> to vector<16x64xf32>
    %5 = arith.addf %2, %4 : vector<16x64xf32>
    %cst_5 = arith.constant 0.000000e+00 : f32
    %6 = vector.broadcast %cst_5 : f32 to vector<16x64xf32>
    %7 = arith.maximumf %5, %6 : vector<16x64xf32>
    %8 = arith.truncf %7 : vector<16x64xf32> to vector<16x64xbf16>
    %c0_6 = arith.constant 0 : index
    %c0_7 = arith.constant 0 : index
    %9 = vector.load %arg4[%c0_6, %c0_7] : memref<64x64xbf16, #tpu.memory_space<vmem>>, vector<64x64xbf16>
    %cst_8 = arith.constant dense<0.000000e+00> : vector<16x64xf32>
    %10 = tpu.matmul %8, %9, %cst_8 {dimension_numbers = #tpu.dot_dimension_numbers<[1], [0], [0], [1], [0, 0, 1, 1], [], []>} : vector<16x64xbf16>, vector<64x64xbf16>, vector<16x64xf32> -> vector<16x64xf32>
    %c0_9 = arith.constant 0 : index
    %c0_10 = arith.constant 0 : index
    %11 = vector.load %arg5[%c0_9, %c0_10] : memref<1x64xf32, #tpu.memory_space<vmem>>, vector<1x64xf32>
    %12 = vector.broadcast %11 : vector<1x64xf32> to vector<16x64xf32>
    %13 = arith.addf %10, %12 : vector<16x64xf32>
    %cst_11 = arith.constant 0.000000e+00 : f32
    %14 = vector.broadcast %cst_11 : f32 to vector<16x64xf32>
    %15 = arith.maximumf %13, %14 : vector<16x64xf32>
    %c0_12 = arith.constant 0 : index
    %c0_13 = arith.constant 0 : index
    %16 = vector.load %arg6[%c0_12, %c0_13] : memref<32x128xbf16, #tpu.memory_space<vmem>>, vector<32x128xbf16>
    %cst_14 = arith.constant dense<0.000000e+00> : vector<16x128xf32>
    %17 = tpu.matmul %0, %16, %cst_14 {dimension_numbers = #tpu.dot_dimension_numbers<[1], [0], [0], [1], [0, 0, 1, 1], [], []>} : vector<16x32xbf16>, vector<32x128xbf16>, vector<16x128xf32> -> vector<16x128xf32>
    %18 = arith.truncf %15 : vector<16x64xf32> to vector<16x64xbf16>
    %c0_15 = arith.constant 0 : index
    %c0_16 = arith.constant 0 : index
    %19 = vector.load %arg7[%c0_15, %c0_16] : memref<64x128xbf16, #tpu.memory_space<vmem>>, vector<64x128xbf16>
    %cst_17 = arith.constant dense<0.000000e+00> : vector<16x128xf32>
    %20 = tpu.matmul %18, %19, %cst_17 {dimension_numbers = #tpu.dot_dimension_numbers<[1], [0], [0], [1], [0, 0, 1, 1], [], []>} : vector<16x64xbf16>, vector<64x128xbf16>, vector<16x128xf32> -> vector<16x128xf32>
    %21 = arith.addf %17, %20 : vector<16x128xf32>
    %c0_18 = arith.constant 0 : index
    %c0_19 = arith.constant 0 : index
    %22 = vector.load %arg8[%c0_18, %c0_19] : memref<1x128xf32, #tpu.memory_space<vmem>>, vector<1x128xf32>
    %23 = vector.broadcast %22 : vector<1x128xf32> to vector<16x128xf32>
    %24 = arith.addf %21, %23 : vector<16x128xf32>
    %25 = tpu.iota {dimensions = array<i32: 1>} : vector<16x128xi32>
    %c7_i32 = arith.constant 7 : i32
    %26 = vector.broadcast %c7_i32 : i32 to vector<16x128xi32>
    %27 = arith.cmpi sge, %25, %26 : vector<16x128xi32>
    %c11_i32 = arith.constant 11 : i32
    %28 = vector.broadcast %c11_i32 : i32 to vector<16x128xi32>
    %29 = arith.cmpi slt, %25, %28 : vector<16x128xi32>
    %30 = arith.andi %27, %29 : vector<16x128xi1>
    %31 = arith.negf %24 : vector<16x128xf32>
    %32 = math.exp %31 : vector<16x128xf32>
    %cst_20 = arith.constant 1.000000e+00 : f32
    %33 = vector.broadcast %cst_20 : f32 to vector<16x128xf32>
    %34 = arith.addf %33, %32 : vector<16x128xf32>
    %35 = arith.divf %33, %34 : vector<16x128xf32>
    %36 = arith.select %30, %35, %24 : vector<16x128xi1>, vector<16x128xf32>
    %c0_21 = arith.constant 0 : index
    %c0_22 = arith.constant 0 : index
    %37 = vector.load %arg9[%c0_21, %c0_22] : memref<16x128xf32, #tpu.memory_space<vmem>>, vector<16x128xf32>
    tpu.vector_store %arg9[%c0_21, %c0_22], %36 {strides = array<i32>} : memref<16x128xf32, #tpu.memory_space<vmem>>, vector<16x128xf32>,
    return
  }
  func.func @transform_0(%arg0: i32) -> (i32, i32) {
    %c0_i32 = arith.constant 0 : i32
    %c0_i32_0 = arith.constant 0 : i32
    return %arg0, %c0_i32 : i32, i32
  }
  func.func @transform_1(%arg0: i32) -> (i32, i32) {
    %c0_i32 = arith.constant 0 : i32
    %c0_i32_0 = arith.constant 0 : i32
    %c0_i32_1 = arith.constant 0 : i32
    return %c0_i32, %c0_i32_0 : i32, i32
  }
  func.func @transform_2(%arg0: i32) -> (i32, i32) {
    %c0_i32 = arith.constant 0 : i32
    %c0_i32_0 = arith.constant 0 : i32
    %c0_i32_1 = arith.constant 0 : i32
    return %c0_i32, %c0_i32_0 : i32, i32
  }
  func.func @transform_3(%arg0: i32) -> (i32, i32) {
    %c0_i32 = arith.constant 0 : i32
    %c0_i32_0 = arith.constant 0 : i32
    %c0_i32_1 = arith.constant 0 : i32
    return %c0_i32, %c0_i32_0 : i32, i32
  }
  func.func @transform_4(%arg0: i32) -> (i32, i32) {
    %c0_i32 = arith.constant 0 : i32
    %c0_i32_0 = arith.constant 0 : i32
    %c0_i32_1 = arith.constant 0 : i32
    return %c0_i32, %c0_i32_0 : i32, i32
  }
  func.func @transform_5(%arg0: i32) -> (i32, i32) {
    %c0_i32 = arith.constant 0 : i32
    %c0_i32_0 = arith.constant 0 : i32
    %c0_i32_1 = arith.constant 0 : i32
    return %c0_i32, %c0_i32_0 : i32, i32
  }
  func.func @transform_6(%arg0: i32) -> (i32, i32) {
    %c0_i32 = arith.constant 0 : i32
    %c0_i32_0 = arith.constant 0 : i32
    %c0_i32_1 = arith.constant 0 : i32
    return %c0_i32, %c0_i32_0 : i32, i32
  }
  func.func @transform_7(%arg0: i32) -> (i32, i32) {
    %c0_i32 = arith.constant 0 : i32
    %c0_i32_0 = arith.constant 0 : i32
    %c0_i32_1 = arith.constant 0 : i32
    return %c0_i32, %c0_i32_0 : i32, i32
  }
  func.func @transform_8(%arg0: i32) -> (i32, i32) {
    %c0_i32 = arith.constant 0 : i32
    %c0_i32_0 = arith.constant 0 : i32
    return %arg0, %c0_i32 : i32, i32
  }
}

</mosaic_0001>

<bundles_post_ra>
// kernel: graph_detr_forward.5
= control target key start
LH: loop header
LB: loop body
LE: loop exit
PB: predicated region body
PF: predicated region fallthrough
CT: control target
= control target key end

     0   :  { %v463_v0 = vmov 0.0   ;;  %vm464_vm0 = vmmov 0   ;;  %vm60_vm1 = vcmask 261120   ;;  %vm147_vm2 = vcmask 523264   ;;  %s572_s1 = inlined_call_operand.vmem [shape: bf16[32,64], index: 1, kind: input, shape index: {}]   ;;  %s573_s3 = inlined_call_operand.vmem [shape: bf16[64,64], index: 3, kind: input, shape index: {}]   ;;  %s574_s0 = inlined_call_operand.vmem [shape: bf16[16,32], index: 0, kind: input, shape index: {}]   ;;  %s575_s6 = inlined_call_operand.vmem [shape: bf16[64,128], index: 6, kind: input, shape index: {}]   ;;  %s576_s5 = inlined_call_operand.vmem [shape: bf16[32,128], index: 5, kind: input, shape index: {}]   ;;  %s577_s2 = inlined_call_operand.vmem [shape: f32[1,64], index: 2, kind: input, shape index: {}]   ;;  %s578_s4 = inlined_call_operand.vmem [shape: f32[1,64], index: 4, kind: input, shape index: {}]   ;;  %s579_s7 = inlined_call_operand.vmem [shape: f32[1,128], index: 7, kind: input, shape index: {}]   ;;  %s580_s8 = inlined_call_operand.vmem [shape: f32[16,128], index: 8, kind: output, shape index: {}]  }
   0x1   :  { %400 = vmatprep.subr.bf16.mxu0 %v463_v0  ;;  %v442_v1 = vld [vmem:[%s572_s1] sm:$0xff]   ;;  %404 = vmatprep.mubr.msk.bf16.mxu0 %vm464_vm0, %v463_v0  ;;  %v443_v2 = vld [vmem:[%s572_s1 + $0x8] sm:$0xff]   ;;  %v447_v6 = vld [vmem:[%s573_s3 + $0x10] sm:$0xff]   ;;  %v337_v50 = vlaneseq }
   0x2   :  { %408 = vmatprep.subr.bf16.mxu1 %v463_v0  ;;  %416 = vmatprep.mubr.msk.bf16.mxu1 %vm464_vm0, %v463_v0  ;;  %v445_v3 = vld [vmem:[%s573_s3] sm:$0xff]   ;;  %v446_v5 = vld [vmem:[%s573_s3 + $0x8] sm:$0xff]   ;;  %v448_v7 = vld [vmem:[%s573_s3 + $0x18] sm:$0xff]  }
   0x3   :  { %401 = vmatpush3.bf16.msra.mxu0 %v442_v1  ;;  %v444_v4 = vld [vmem:[%s574_s0] sm:$0xff]   ;;  %409 = vmatpush3.bf16.msra.mxu1 %v445_v3  ;;  %v450_v9 = vld [vmem:[%s575_s6 + $0x8] sm:$0xff]   ;;  %v452_v21 = vld [vmem:[%s575_s6 + $0x10] sm:$0xff]   ;;  %v338_v54 = vand.u32 127, %v337_v50 }
   0x4   :  { %402 = vmatprep.subr.bf16.mxu0 %v463_v0  ;;  %410 = vmatprep.subr.bf16.mxu1 %v463_v0  ;;  %v449_v8 = vld [vmem:[%s575_s6] sm:$0xff]   ;;  %v453_v22 = vld [vmem:[%s576_s5 + $0x8] sm:$0xff]   ;;  %v454_v23 = vld [vmem:[%s575_s6 + $0x18] sm:$0xff]  }
   0x5   :  { %v362_v10 = vld [vmem:[%s577_s2] ss:$0 sm:$0xff]  ;;  %vm339_vm3 = vcmp.ge.s32.totalorder %v338_v54, 7  ;;  %vm340_vm4 = vcmp.lt.s32.totalorder %v338_v54, 11 }
   0x6   :  { %v451_v19 = vld [vmem:[%s576_s5] sm:$0xff]   ;;  %vm341_vm5 = vmand %vm339_vm3, %vm340_vm4 }
   0x7   :  { %403 = vmatpush3.bf16.msra.mxu0 %v443_v2  ;;  %411 = vmatpush3.bf16.msra.mxu1 %v446_v5  ;;  %v367_v24 = vld [vmem:[%s578_s4] ss:$0 sm:$0xff] }
   0x8   :  { %420 = vmatprep.subr.bf16.mxu0 %v463_v0  ;;  %412 = vmatprep.subr.bf16.mxu1 %v463_v0  ;;  %v381_v39 = vld [vmem:[%s579_s7] ss:$0 sm:$0xff] }
   0xa   :  { %405 = vmatmul.mubr.msk.bf16.vlgmr.msra.gmra.mrb[0].mxu0 %vm60_vm1, %v444_v4 }
   0xb   :  { %428 = vmatprep.mubr.msk.bf16.mxu0 %vm464_vm0, %v463_v0  ;;  %413 = vmatpush3.bf16.msra.mxu1 %v447_v6 }
   0xc   :  { %414 = vmatprep.subr.bf16.mxu1 %v463_v0  ;;  %421 = vmatpush3.bf16.msra.mxu0 %v449_v8 }
   0xd   :  { %422 = vmatprep.subr.bf16.mxu0 %v463_v0 }
   0xf   :  { %415 = vmatpush3.bf16.msra.mxu1 %v448_v7 }
  0x10   :  { %432 = vmatprep.subr.bf16.mxu1 %v463_v0  ;;  %423 = vmatpush3.bf16.msra.mxu0 %v450_v9 }
  0x11   :  { %424 = vmatprep.subr.bf16.mxu0 %v463_v0 }
  0x14   :  { %425 = vmatpush3.bf16.msra.mxu0 %v452_v21 }
  0x15   :  { %426 = vmatprep.subr.bf16.mxu0 %v463_v0 }
  0x18   :  { %427 = vmatpush3.bf16.msra.mxu0 %v454_v23 }
  0xdd   :  { %v98_v11 = vpop.f32.mrb[0].mxu0 }
  0xde   :  { %v99_v12 = vadd.f32 %v362_v10, %v98_v11  ;;  %v406_v13 = vpop.f32.mrb[1].mxu0 }
  0xdf   :  { %v101_v14 = vpop.f32.mrb[2].mxu0 }
  0xe0   :  { %v102_v15 = vadd.f32 %v362_v10, %v101_v14  ;;  %v407_v16 = vpop.f32.mrb[3].mxu0  ;;  %v105_v17 = vmax.f32 %v99_v12, 0.0 }
  0xe2   :  { %v106_v18 = vmax.f32 %v102_v15, 0.0 }
  0xe4   :  { %v107_v20 = vpack.c.bf16 %v106_v18, %v105_v17 }
  0xe6   :  { %417 = vmatmul.mubr.msk.bf16.vlgmr.msra.gmra.mrb[0].mxu1 %vm147_vm2, %v107_v20 }
  0xe7   :  { %433 = vmatpush3.bf16.msra.mxu1 %v451_v19  ;;  %436 = vmatprep.mubr.msk.bf16.mxu1 %vm464_vm0, %v463_v0 }
  0xe8   :  { %434 = vmatprep.subr.bf16.mxu1 %v463_v0 }
  0xeb   :  { %435 = vmatpush3.bf16.msra.mxu1 %v453_v22 }
  0xee   :  { %437 = vmatmul.mubr.msk.bf16.vlgmr.msra.gmra.mrb[4].mxu1 %vm60_vm1, %v444_v4 }
 0x1b9   :  { %v185_v25 = vpop.f32.mrb[0].mxu1 }
 0x1ba   :  { %v186_v26 = vadd.f32 %v367_v24, %v185_v25  ;;  %v418_v27 = vpop.f32.mrb[1].mxu1 }
 0x1bb   :  { %v188_v28 = vpop.f32.mrb[2].mxu1 }
 0x1bc   :  { %v189_v29 = vadd.f32 %v367_v24, %v188_v28  ;;  %v419_v30 = vpop.f32.mrb[3].mxu1  ;;  %v192_v31 = vmax.f32 %v186_v26, 0.0 }
 0x1be   :  { %v193_v32 = vmax.f32 %v189_v29, 0.0 }
 0x1c0   :  { %v198_v33 = vpack.c.bf16 %v193_v32, %v192_v31 }
 0x1c1   :  { %v321_v34 = vpop.f32.mrb[4].mxu1 }
 0x1c2   :  { %429 = vmatmul.mubr.msk.bf16.vlgmr.msra.gmra.mrb[4].mxu0 %vm147_vm2, %v198_v33  ;;  %v438_v35 = vpop.f32.mrb[5].mxu1 }
 0x1c3   :  { %v324_v36 = vpop.f32.mrb[6].mxu1 }
 0x1c4   :  { %v439_v37 = vpop.f32.mrb[7].mxu1 }
 0x295   :  { %v268_v38 = vpop.f32.mrb[4].mxu0 }
 0x296   :  { %v322_v40 = vadd.f32 %v321_v34, %v268_v38  ;;  %v430_v41 = vpop.f32.mrb[5].mxu0 }
 0x297   :  { %v271_v42 = vpop.f32.mrb[6].mxu0 }
 0x298   :  { %v335_v43 = vadd.f32 %v381_v39, %v322_v40  ;;  %v325_v44 = vadd.f32 %v324_v36, %v271_v42  ;;  %v431_v45 = vpop.f32.mrb[7].mxu0 }
 0x29a   :  { %v382_v46 = vmul.f32 -1.442695, %v335_v43  ;;  %v336_v47 = vadd.f32 %v381_v39, %v325_v44 }
 0x29c   :  { %455 = vpow2.f32 %v382_v46  ;;  %v383_v48 = vmul.f32 -1.442695, %v336_v47 }
 0x29e   :  { %457 = vpow2.f32 %v383_v48 }
 0x2a6   :  { %v456_v49 = vpop.eup %455 }
 0x2a7   :  { %v348_v51 = vadd.f32 1.0, %v456_v49 }
 0x2a8   :  { %v458_v52 = vpop.eup %457 }
 0x2a9   :  { %459 = vrcp.f32 %v348_v51  ;;  %v349_v53 = vadd.f32 1.0, %v458_v52 }
 0x2ab   :  { %461 = vrcp.f32 %v349_v53 }
 0x2b3   :  { %v460_v55 = vpop.eup %459 }
 0x2b4   :  { %v354_v56 = vsel %vm341_vm5, %v460_v55, %v335_v43 }
 0x2b5   :  { %v462_v57 = vpop.eup %461  ;;  %356 = vst [vmem:[%s580_s8] sm:$0xff] %v354_v56 }
 0x2b6   :  { %v355_v58 = vsel %vm341_vm5, %v462_v57, %v336_v47 }
 0x2b7   :  { %357 = vst [vmem:[%s580_s8 + $0x8] sm:$0xff] %v355_v58 }

// kernel: graph_detr_forward.3
= control target key start
LH: loop header
LB: loop body
LE: loop exit
PB: predicated region body
PF: predicated region fallthrough
CT: control target
= control target key end

     0   :  { %v690_v0 = vmov 0   ;;  %v691_v10 = vmov 1   ;;  %v692_v14 = vmov 2   ;;  %vm419_vm0 = vcmask 1041408   ;;  %s969_s0 = inlined_call_operand.vmem [shape: f32[128,3], index: 0, kind: input, shape index: {}]   ;;  %s970_s3 = inlined_call_operand.vmem [shape: bf16[4,32], index: 3, kind: input, shape index: {}]   ;;  %s971_s1 = inlined_call_operand.vmem [shape: f32[3,4], index: 1, kind: input, shape index: {}]   ;;  %s972_s2 = inlined_call_operand.vmem [shape: f32[1,4], index: 2, kind: input, shape index: {}]   ;;  %s973_s4 = inlined_call_operand.vmem [shape: f32[1,32], index: 4, kind: input, shape index: {}]   ;;  %s974_s5 = inlined_call_operand.vmem [shape: bf16[128,32], index: 5, kind: output, shape index: {}]  }
   0x1   :  { %682 = vset.pattern.permute.xlu1 %v690_v0  ;;  %681 = vset.pattern.permute.xlu0 %v690_v0  ;;  %v29_v1 = vld [vmem:[%s969_s0 + $0x40] sm:$0xff]  ;;  %v30_v3 = vld [vmem:[%s969_s0 + $0x48] sm:$0xff]  ;;  %v24_v5 = vld [vmem:[%s969_s0 + $0x18] sm:$0xff]  ;;  %v126_v29 = vlaneseq  ;;  %vm394_vm1 = vcmask 31744   ;;  %vm584_vm2 = vcmask 257024  }
   0x2   :  { %v21_v2 = vld [vmem:[%s969_s0] sm:$0xff]  ;;  %88 = vperm.xlu1 %682, %v29_v1   ;;  %v22_v4 = vld [vmem:[%s969_s0 + $0x8] sm:$0xff]  ;;  %v23_v6 = vld [vmem:[%s969_s0 + $0x10] sm:$0xff] }
   0x3   :  { %48 = vperm.xlu0 %681, %v21_v2   ;;  %v32_v7 = vld [vmem:[%s969_s0 + $0x58] sm:$0xff]  ;;  %v31_v8 = vld [vmem:[%s969_s0 + $0x50] sm:$0xff]  ;;  %v25_v9 = vld [vmem:[%s969_s0 + $0x20] sm:$0xff]  ;;  %v127_v32 = vshrl.u32 %v126_v29, 7 }
   0x4   :  { %v34_v11 = vld [vmem:[%s969_s0 + $0x68] sm:$0xff]  ;;  %v28_v12 = vld [vmem:[%s969_s0 + $0x38] sm:$0xff]  ;;  %v27_v16 = vld [vmem:[%s969_s0 + $0x30] sm:$0xff] }
   0x5   :  { %v36_v13 = vld [vmem:[%s969_s0 + $0x78] sm:$0xff]  ;;  %v26_v15 = vld [vmem:[%s969_s0 + $0x28] sm:$0xff]  ;;  %v35_v17 = vld [vmem:[%s969_s0 + $0x70] sm:$0xff]  ;;  %v128_v35 = vsub.s32 0, %v127_v32  ;;  %v228_v43 = vsub.s32 1, %v127_v32  ;;  %v328_v45 = vsub.s32 2, %v127_v32 }
   0x6   :  { %93 = vperm.xlu1 %682, %v30_v3   ;;  %v33_v18 = vld [vmem:[%s969_s0 + $0x60] sm:$0xff] }
   0x7   :  { %53 = vperm.xlu0 %681, %v22_v4   ;;  %v386_v19 = vld [vmem:[%s970_s3] sm:$0x3] }
   0x8   :  { %676 = vmatprep.subr.msk.bf16.mxu0 %vm419_vm0, %v386_v19  ;;  %v421_v20 = vsel %vm419_vm0, %v386_v19, 0  ;;  %677 = vmatprep.subr.msk.bf16.mxu1 %vm419_vm0, %v386_v19  ;;  %v37_v36 = vld [vmem:[%s971_s1] sm:$0x7] }
   0x9   :  { %657 = vmatpush3.bf16.msra.mxu0 %v421_v20  ;;  %675 = vmatpush3.bf16.msra.mxu1 %v421_v20  ;;  %v789_v39 = vrot.slane %v37_v36, %v128_v35  ;;  %v797_v48 = vrot.slane %v37_v36, %v228_v43  ;;  %v802_v49 = vld [vmem:[%s972_s2] ss:$0 sm:$0xff]  ;;  %v806_v52 = vrot.slane %v37_v36, %v328_v45 }
   0xa   :  { %63 = vperm.xlu1 %682, %v24_v5  }
   0xb   :  { %58 = vperm.xlu0 %681, %v23_v6  }
   0xe   :  { %103 = vperm.xlu1 %682, %v32_v7  }
   0xf   :  { %98 = vperm.xlu0 %681, %v31_v8  }
  0x12   :  { %683 = vset.pattern.permute.xlu1 %v691_v10 }
  0x13   :  { %68 = vperm.xlu0 %681, %v25_v9   ;;  %167 = vperm.xlu1 %683, %v22_v4  }
  0x17   :  { %113 = vperm.xlu0 %681, %v34_v11   ;;  %195 = vperm.xlu1 %683, %v29_v1  }
  0x1b   :  { %83 = vperm.xlu0 %681, %v28_v12   ;;  %171 = vperm.xlu1 %683, %v23_v6  }
  0x1f   :  { %123 = vperm.xlu0 %681, %v36_v13   ;;  %203 = vperm.xlu1 %683, %v31_v8  }
  0x23   :  { %686 = vset.pattern.permute.xlu0 %v691_v10  ;;  %684 = vset.pattern.permute.xlu1 %v692_v14 }
  0x24   :  { %163 = vperm.xlu0 %686, %v21_v2   ;;  %263 = vperm.xlu1 %684, %v21_v2  }
  0x28   :  { %199 = vperm.xlu0 %686, %v30_v3   ;;  %295 = vperm.xlu1 %684, %v29_v1  }
  0x2c   :  { %175 = vperm.xlu0 %686, %v24_v5   ;;  %299 = vperm.xlu1 %684, %v30_v3  }
  0x30   :  { %207 = vperm.xlu0 %686, %v32_v7   ;;  %275 = vperm.xlu1 %684, %v24_v5  }
  0x34   :  { %183 = vperm.xlu0 %686, %v26_v15   ;;  %307 = vperm.xlu1 %684, %v32_v7  }
  0x38   :  { %187 = vperm.xlu0 %686, %v27_v16   ;;  %685 = vset.pattern.permute.xlu1 %v690_v0 }
  0x39   :  { %73 = vperm.xlu1 %685, %v26_v15  }
  0x3c   :  { %219 = vperm.xlu0 %686, %v35_v17  }
  0x3d   :  { %108 = vperm.xlu1 %685, %v33_v18  }
  0x40   :  { %688 = vset.pattern.permute.xlu0 %v692_v14 }
  0x41   :  { %267 = vperm.xlu0 %688, %v22_v4   ;;  %78 = vperm.xlu1 %685, %v27_v16  }
  0x45   :  { %271 = vperm.xlu0 %688, %v23_v6   ;;  %118 = vperm.xlu1 %685, %v35_v17  }
  0x49   :  { %303 = vperm.xlu0 %688, %v31_v8   ;;  %687 = vset.pattern.permute.xlu1 %v691_v10 }
  0x4a   :  { %179 = vperm.xlu1 %687, %v25_v9  }
  0x4d   :  { %279 = vperm.xlu0 %688, %v25_v9  }
  0x4e   :  { %211 = vperm.xlu1 %687, %v33_v18  }
  0x51   :  { %315 = vperm.xlu0 %688, %v34_v11  }
  0x52   :  { %215 = vperm.xlu1 %687, %v34_v11  }
  0x55   :  { %291 = vperm.xlu0 %688, %v28_v12  }
  0x56   :  { %191 = vperm.xlu1 %687, %v28_v12  }
  0x59   :  { %323 = vperm.xlu0 %688, %v36_v13  }
  0x5a   :  { %223 = vperm.xlu1 %687, %v36_v13  }
  0x5e   :  { %689 = vset.pattern.permute.xlu1 %v692_v14 }
  0x5f   :  { %283 = vperm.xlu1 %689, %v26_v15  }
  0x63   :  { %311 = vperm.xlu1 %689, %v33_v18  }
  0x67   :  { %287 = vperm.xlu1 %689, %v27_v16  }
  0x6b   :  { %319 = vperm.xlu1 %689, %v35_v17  }
  0x81   :  { %v89_v21 = vpop.permute.xlu1 %88 }
  0x82   :  { %v49_v22 = vpop.permute.xlu0 %48  ;;  %v138_v47 = vmul.f32 %v789_v39, %v89_v21 }
  0x83   :  { %v130_v9 = vmul.f32 %v789_v39, %v49_v22 }
  0x84   :  { %v154_v55 = vadd.f32 %v802_v49, %v138_v47 }
  0x85   :  { %v94_v23 = vpop.permute.xlu1 %93  ;;  %v146_v14 = vadd.f32 %v802_v49, %v130_v9 }
  0x86   :  { %v54_v24 = vpop.permute.xlu0 %53  ;;  %v139_v50 = vmul.f32 %v789_v39, %v94_v23 }
  0x87   :  { %v131_v12 = vmul.f32 %v789_v39, %v54_v24 }
  0x88   :  { %v155_v58 = vadd.f32 %v802_v49, %v139_v50 }
  0x89   :  { %v64_v25 = vpop.permute.xlu1 %63  ;;  %v147_v18 = vadd.f32 %v802_v49, %v131_v12 }
  0x8a   :  { %v774_v26 = vpop.permute.xlu0 %58  ;;  %v133_v19 = vmul.f32 %v789_v39, %v64_v25 }
  0x8b   :  { %v132_v22 = vmul.f32 %v789_v39, %v774_v26 }
  0x8c   :  { %v149_v35 = vadd.f32 %v802_v49, %v133_v19 }
  0x8d   :  { %v776_v27 = vpop.permute.xlu1 %103  ;;  %v148_v26 = vadd.f32 %v802_v49, %v132_v22 }
  0x8e   :  { %v778_v28 = vpop.permute.xlu0 %98  ;;  %v141_v24 = vmul.f32 %v789_v39, %v776_v27 }
  0x8f   :  { %v140_v43 = vmul.f32 %v789_v39, %v778_v28 }
  0x90   :  { %v157_v45 = vadd.f32 %v802_v49, %v141_v24 }
  0x91   :  { %v156_v28 = vadd.f32 %v802_v49, %v140_v43 }
  0x92   :  { %v780_v30 = vpop.permute.xlu0 %68  ;;  %v168_v31 = vpop.permute.xlu1 %167 }
  0x93   :  { %v231_v20 = vmul.f32 %v797_v48, %v168_v31 }
  0x95   :  { %v247_v36 = vadd.f32 %v231_v20, %v147_v18  ;;  %v134_v20 = vmul.f32 %v789_v39, %v780_v30 }
  0x96   :  { %v782_v33 = vpop.permute.xlu0 %113  ;;  %v196_v34 = vpop.permute.xlu1 %195 }
  0x97   :  { %v238_v51 = vmul.f32 %v797_v48, %v196_v34 }
  0x99   :  { %v254_v59 = vadd.f32 %v238_v51, %v154_v55 }
  0x9a   :  { %v787_v37 = vpop.permute.xlu0 %83  ;;  %v172_v38 = vpop.permute.xlu1 %171 }
  0x9b   :  { %v232_v29 = vmul.f32 %v797_v48, %v172_v38 }
  0x9e   :  { %v124_v40 = vpop.permute.xlu0 %123  ;;  %v794_v42 = vpop.permute.xlu1 %203 }
  0x9f   :  { %v792_v41 = vmul.f32 %v789_v39, %v124_v40  ;;  %v240_v47 = vmul.f32 %v797_v48, %v794_v42 }
  0xa3   :  { %v164_v44 = vpop.permute.xlu0 %163  ;;  %v264_v46 = vpop.permute.xlu1 %263 }
  0xa4   :  { %v230_v11 = vmul.f32 %v797_v48, %v164_v44  ;;  %v330_v17 = vmul.f32 %v806_v52, %v264_v46  ;;  %v248_v46 = vadd.f32 %v232_v29, %v148_v26  ;;  %v150_v29 = vadd.f32 %v802_v49, %v134_v20  ;;  %v606_v20 = vld [vmem:[%s973_s4] ss:$0 sm:$0xff] }
  0xa6   :  { %v246_v16 = vadd.f32 %v230_v11, %v146_v14 }
  0xa7   :  { %v200_v53 = vpop.permute.xlu0 %199  ;;  %v296_v54 = vpop.permute.xlu1 %295 }
  0xa8   :  { %v239_v56 = vmul.f32 %v797_v48, %v200_v53  ;;  %v338_v57 = vmul.f32 %v806_v52, %v296_v54  ;;  %v346_v32 = vadd.f32 %v330_v17, %v246_v16 }
  0xaa   :  { %v255_v62 = vadd.f32 %v239_v56, %v155_v58  ;;  %v354_v63 = vadd.f32 %v338_v57, %v254_v59  ;;  %v362_v50 = vmax.f32 %v346_v32, 0.0  ;;  %v143_v32 = vmul.f32 %v789_v39, %v782_v33 }
  0xab   :  { %v176_v60 = vpop.permute.xlu0 %175  ;;  %v300_v61 = vpop.permute.xlu1 %299 }
  0xac   :  { %v339_v0 = vmul.f32 %v806_v52, %v300_v61  ;;  %v370_v4 = vmax.f32 %v354_v63, 0.0  ;;  %v233_v23 = vmul.f32 %v797_v48, %v176_v60 }
  0xae   :  { %v355_v1 = vadd.f32 %v339_v0, %v255_v62  ;;  %v249_v44 = vadd.f32 %v233_v23, %v149_v35  ;;  %v256_v62 = vadd.f32 %v240_v47, %v156_v28 }
  0xaf   :  { %v208_v2 = vpop.permute.xlu0 %207  ;;  %v276_v3 = vpop.permute.xlu1 %275 }
  0xb0   :  { %v371_v5 = vmax.f32 %v355_v1, 0.0  ;;  %v333_v25 = vmul.f32 %v806_v52, %v276_v3  ;;  %v241_v27 = vmul.f32 %v797_v48, %v208_v2 }
  0xb2   :  { %v382_v7 = vpack.c.bf16 %v371_v5, %v370_v4  ;;  %v349_v53 = vadd.f32 %v333_v25, %v249_v44  ;;  %v257_v59 = vadd.f32 %v241_v27, %v157_v45  ;;  %v161_v25 = vadd.f32 %v802_v49, %v792_v41 }
  0xb3   :  { %v813_v6 = vpop.permute.xlu0 %183  ;;  %v308_v8 = vpop.permute.xlu1 %307  ;;  %v137_v41 = vmul.f32 %v789_v39, %v787_v37 }
  0xb4   :  { %666 = vmatprep.mubr.msk.bf16.mxu1 %vm394_vm1, %v382_v7  ;;  %v341_v54 = vmul.f32 %v806_v52, %v308_v8  ;;  %v365_v1 = vmax.f32 %v349_v53, 0.0  ;;  %v235_v26 = vmul.f32 %v797_v48, %v813_v6 }
  0xb5   :  { %v153_v37 = vadd.f32 %v802_v49, %v137_v41 }
  0xb6   :  { %v357_v2 = vadd.f32 %v341_v54, %v257_v59 }
  0xb7   :  { %v817_v10 = vpop.permute.xlu0 %187 }
  0xb8   :  { %v821_v13 = vpop.permute.xlu1 %73  ;;  %v373_v12 = vmax.f32 %v357_v2, 0.0 }
  0xb9   :  { %v135_v22 = vmul.f32 %v789_v39, %v821_v13 }
  0xbb   :  { %v220_v15 = vpop.permute.xlu0 %219 }
  0xbc   :  { %v828_v21 = vpop.permute.xlu1 %108  ;;  %v244_v63 = vmul.f32 %v797_v48, %v220_v15 }
  0xbd   :  { %v142_v33 = vmul.f32 %v789_v39, %v828_v21 }
  0xc0   :  { %v268_v34 = vpop.permute.xlu0 %267  ;;  %v839_v40 = vpop.permute.xlu1 %78 }
  0xc1   :  { %v331_v31 = vmul.f32 %v806_v52, %v268_v34  ;;  %v151_v34 = vadd.f32 %v802_v49, %v135_v22 }
  0xc3   :  { %v347_v38 = vadd.f32 %v331_v31, %v247_v36  ;;  %v251_v45 = vadd.f32 %v235_v26, %v151_v34 }
  0xc4   :  { %v272_v51 = vpop.permute.xlu0 %271  ;;  %v119_v57 = vpop.permute.xlu1 %118 }
  0xc5   :  { %v363_v55 = vmax.f32 %v347_v38, 0.0  ;;  %v332_v56 = vmul.f32 %v806_v52, %v272_v51  ;;  %v144_v58 = vmul.f32 %v789_v39, %v119_v57  ;;  %v159_v38 = vadd.f32 %v802_v49, %v143_v32 }
  0xc7   :  { %v348_v60 = vadd.f32 %v332_v56, %v248_v46  ;;  %v378_v61 = vpack.c.bf16 %v363_v55, %v362_v50  ;;  %v160_v42 = vadd.f32 %v802_v49, %v144_v58  ;;  %v136_v46 = vmul.f32 %v789_v39, %v839_v40 }
  0xc8   :  { %v304_v0 = vpop.permute.xlu0 %303  ;;  %v158_v56 = vadd.f32 %v802_v49, %v142_v33 }
  0xc9   :  { %v364_v3 = vmax.f32 %v348_v60, 0.0  ;;  %v340_v4 = vmul.f32 %v806_v52, %v304_v0  ;;  %658 = vmatprep.mubr.msk.bf16.mxu0 %vm394_vm1, %v378_v61  ;;  %v180_v5 = vpop.permute.xlu1 %179  ;;  %v856_v7 = vadd.f32 %v244_v63, %v160_v42  ;;  %v152_v28 = vadd.f32 %v802_v49, %v136_v46 }
  0xca   :  { %v234_v24 = vmul.f32 %v797_v48, %v180_v5  ;;  %v236_v63 = vmul.f32 %v797_v48, %v817_v10 }
  0xcb   :  { %v379_v8 = vpack.c.bf16 %v365_v1, %v364_v3  ;;  %v356_v9 = vadd.f32 %v340_v4, %v256_v62 }
  0xcc   :  { %v280_v11 = vpop.permute.xlu0 %279  ;;  %v250_v31 = vadd.f32 %v234_v24, %v150_v29  ;;  %v252_v3 = vadd.f32 %v236_v63, %v152_v28 }
  0xcd   :  { %v372_v14 = vmax.f32 %v356_v9, 0.0  ;;  %659 = vmatmul.mubr.msk.bf16.vlgmr.msra.gmra.mrb[0].mxu0 %vm394_vm1, %v379_v8  ;;  %v212_v15 = vpop.permute.xlu1 %211  ;;  %v334_v30 = vmul.f32 %v806_v52, %v280_v11 }
  0xce   :  { %v242_v6 = vmul.f32 %v797_v48, %v212_v15 }
  0xcf   :  { %v383_v16 = vpack.c.bf16 %v373_v12, %v372_v14  ;;  %v350_v47 = vadd.f32 %v334_v30, %v250_v31 }
  0xd0   :  { %v316_v17 = vpop.permute.xlu0 %315  ;;  %v258_v40 = vadd.f32 %v242_v6, %v158_v56 }
  0xd1   :  { %667 = vmatmul.mubr.msk.bf16.vlgmr.msra.gmra.mrb[0].mxu1 %vm394_vm1, %v383_v16  ;;  %v216_v18 = vpop.permute.xlu1 %215  ;;  %v343_v53 = vmul.f32 %v806_v52, %v316_v17  ;;  %v366_v39 = vmax.f32 %v350_v47, 0.0 }
  0xd2   :  { %v243_v43 = vmul.f32 %v797_v48, %v216_v18 }
  0xd4   :  { %v292_v19 = vpop.permute.xlu0 %291  ;;  %v259_v21 = vadd.f32 %v243_v43, %v159_v38 }
  0xd5   :  { %v192_v23 = vpop.permute.xlu1 %191  ;;  %v337_v42 = vmul.f32 %v806_v52, %v292_v19 }
  0xd6   :  { %v237_v54 = vmul.f32 %v797_v48, %v192_v23  ;;  %v359_v59 = vadd.f32 %v343_v53, %v259_v21 }
  0xd8   :  { %v324_v35 = vpop.permute.xlu0 %323  ;;  %v253_v60 = vadd.f32 %v237_v54, %v153_v37  ;;  %v375_v4 = vmax.f32 %v359_v59, 0.0 }
  0xd9   :  { %v224_v36 = vpop.permute.xlu1 %223  ;;  %v345_v44 = vmul.f32 %v806_v52, %v324_v35 }
  0xda   :  { %v245_v13 = vmul.f32 %v797_v48, %v224_v36  ;;  %v353_v5 = vadd.f32 %v337_v42, %v253_v60 }
  0xdc   :  { %v261_v27 = vadd.f32 %v245_v13, %v161_v25  ;;  %v369_v14 = vmax.f32 %v353_v5, 0.0 }
  0xde   :  { %v361_v50 = vadd.f32 %v345_v44, %v261_v27  ;;  %v284_v51 = vpop.permute.xlu1 %283 }
  0xdf   :  { %v335_v55 = vmul.f32 %v806_v52, %v284_v51 }
  0xe0   :  { %v377_v17 = vmax.f32 %v361_v50, 0.0 }
  0xe1   :  { %v351_v57 = vadd.f32 %v335_v55, %v251_v45 }
  0xe2   :  { %v312_v58 = vpop.permute.xlu1 %311 }
  0xe3   :  { %v367_v61 = vmax.f32 %v351_v57, 0.0  ;;  %v342_v62 = vmul.f32 %v806_v52, %v312_v58 }
  0xe5   :  { %v380_v0 = vpack.c.bf16 %v367_v61, %v366_v39  ;;  %v358_v1 = vadd.f32 %v342_v62, %v258_v40 }
  0xe6   :  { %v288_v2 = vpop.permute.xlu1 %287 }
  0xe7   :  { %v374_v49 = vmax.f32 %v358_v1, 0.0  ;;  %v336_v8 = vmul.f32 %v806_v52, %v288_v2  ;;  %662 = vmatprep.mubr.msk.bf16.mxu0 %vm394_vm1, %v380_v0 }
  0xe9   :  { %v384_v9 = vpack.c.bf16 %v375_v4, %v374_v49  ;;  %v352_v11 = vadd.f32 %v336_v8, %v252_v3 }
  0xea   :  { %v320_v12 = vpop.permute.xlu1 %319 }
  0xeb   :  { %v368_v15 = vmax.f32 %v352_v11, 0.0  ;;  %v344_v48 = vmul.f32 %v806_v52, %v320_v12  ;;  %670 = vmatprep.mubr.msk.bf16.mxu1 %vm394_vm1, %v384_v9 }
  0xed   :  { %v381_v10 = vpack.c.bf16 %v369_v14, %v368_v15  ;;  %v360_v16 = vadd.f32 %v344_v48, %v856_v7 }
  0xef   :  { %v376_v18 = vmax.f32 %v360_v16, 0.0  ;;  %663 = vmatmul.mubr.msk.bf16.gmra.mrb[4].mxu0 %vm394_vm1, %v381_v10 }
  0xf1   :  { %v385_v19 = vpack.c.bf16 %v377_v17, %v376_v18 }
  0xf3   :  { %671 = vmatmul.mubr.msk.bf16.gmra.mrb[4].mxu1 %vm394_vm1, %v385_v19 }
 0x1a0   :  { %v660_v22 = vpop.f32.mrb[0].mxu0 }
 0x1a1   :  { %v466_v23 = vadd.f32 %v660_v22, %v606_v20  ;;  %v457_v24 = vpop.f32.mrb[1].mxu0 }
 0x1a2   :  { %v458_v52 = vadd.f32 %v606_v20, %v457_v24  ;;  %v661_v29 = vpop.f32.mrb[2].mxu0 }
 0x1a3   :  { %v633_v32 = vpack.c.bf16 %v466_v23, %v466_v23  ;;  %v469_v34 = vadd.f32 %v661_v29, %v606_v20  ;;  %v460_v7 = vpop.f32.mrb[3].mxu0 }
 0x1a4   :  { %v631_v35 = vpack.c.bf16 %v458_v52, %v458_v52  ;;  %v461_v36 = vadd.f32 %v606_v20, %v460_v7  ;;  %v668_v25 = vpop.f32.mrb[0].mxu1 }
 0x1a5   :  { %587 = vst.msk [vmem:[%s974_s5 + $0x8] sm:$0xf] %vm584_vm2, %v633_v32  ;;  %v634_v31 = vpack.c.bf16 %v469_v34, %v469_v34  ;;  %v498_v30 = vadd.f32 %v668_v25, %v606_v20  ;;  %v489_v13 = vpop.f32.mrb[1].mxu1 }
 0x1a6   :  { %585 = vst.msk [vmem:[%s974_s5] sm:$0xf] %vm584_vm2, %v631_v35  ;;  %v632_v26 = vpack.c.bf16 %v461_v36, %v461_v36  ;;  %v490_v43 = vadd.f32 %v606_v20, %v489_v13  ;;  %v669_v33 = vpop.f32.mrb[2].mxu1 }
 0x1a7   :  { %588 = vst.msk [vmem:[%s974_s5 + $0xc] sm:$0xf] %vm584_vm2, %v634_v31  ;;  %v641_v44 = vpack.c.bf16 %v498_v30, %v498_v30  ;;  %v501_v27 = vadd.f32 %v669_v33, %v606_v20  ;;  %v492_v38 = vpop.f32.mrb[3].mxu1 }
 0x1a8   :  { %586 = vst.msk [vmem:[%s974_s5 + $0x4] sm:$0xf] %vm584_vm2, %v632_v26  ;;  %v639_v41 = vpack.c.bf16 %v490_v43, %v490_v43  ;;  %v493_v45 = vadd.f32 %v606_v20, %v492_v38 }
 0x1a9   :  { %595 = vst.msk [vmem:[%s974_s5 + $0x28] sm:$0xf] %vm584_vm2, %v641_v44  ;;  %v642_v46 = vpack.c.bf16 %v501_v27, %v501_v27 }
 0x1aa   :  { %593 = vst.msk [vmem:[%s974_s5 + $0x20] sm:$0xf] %vm584_vm2, %v639_v41  ;;  %v640_v47 = vpack.c.bf16 %v493_v45, %v493_v45 }
 0x1ab   :  { %596 = vst.msk [vmem:[%s974_s5 + $0x2c] sm:$0xf] %vm584_vm2, %v642_v46 }
 0x1ac   :  { %594 = vst.msk [vmem:[%s974_s5 + $0x24] sm:$0xf] %vm584_vm2, %v640_v47 }
 0x1c2   :  { %v664_v6 = vpop.f32.mrb[4].mxu0 }
 0x1c3   :  { %v482_v50 = vadd.f32 %v664_v6, %v606_v20  ;;  %v473_v51 = vpop.f32.mrb[5].mxu0 }
 0x1c4   :  { %v474_v53 = vadd.f32 %v606_v20, %v473_v51  ;;  %v665_v21 = vpop.f32.mrb[6].mxu0 }
 0x1c5   :  { %v637_v54 = vpack.c.bf16 %v482_v50, %v482_v50  ;;  %v485_v55 = vadd.f32 %v665_v21, %v606_v20  ;;  %v476_v56 = vpop.f32.mrb[7].mxu0 }
 0x1c6   :  { %v635_v37 = vpack.c.bf16 %v474_v53, %v474_v53  ;;  %v477_v57 = vadd.f32 %v606_v20, %v476_v56  ;;  %v672_v28 = vpop.f32.mrb[4].mxu1 }
 0x1c7   :  { %591 = vst.msk [vmem:[%s974_s5 + $0x18] sm:$0xf] %vm584_vm2, %v637_v54  ;;  %v638_v39 = vpack.c.bf16 %v485_v55, %v485_v55  ;;  %v514_v40 = vadd.f32 %v672_v28, %v606_v20  ;;  %v505_v58 = vpop.f32.mrb[5].mxu1 }
 0x1c8   :  { %589 = vst.msk [vmem:[%s974_s5 + $0x10] sm:$0xf] %vm584_vm2, %v635_v37  ;;  %v636_v59 = vpack.c.bf16 %v477_v57, %v477_v57  ;;  %v506_v60 = vadd.f32 %v606_v20, %v505_v58  ;;  %v673_v61 = vpop.f32.mrb[6].mxu1 }
 0x1c9   :  { %592 = vst.msk [vmem:[%s974_s5 + $0x1c] sm:$0xf] %vm584_vm2, %v638_v39  ;;  %v645_v62 = vpack.c.bf16 %v514_v40, %v514_v40  ;;  %v517_v63 = vadd.f32 %v673_v61, %v606_v20  ;;  %v508_v42 = vpop.f32.mrb[7].mxu1 }
 0x1ca   :  { %590 = vst.msk [vmem:[%s974_s5 + $0x14] sm:$0xf] %vm584_vm2, %v636_v59  ;;  %v643_v0 = vpack.c.bf16 %v506_v60, %v506_v60  ;;  %v509_v1 = vadd.f32 %v606_v20, %v508_v42 }
 0x1cb   :  { %599 = vst.msk [vmem:[%s974_s5 + $0x38] sm:$0xf] %vm584_vm2, %v645_v62  ;;  %v646_v2 = vpack.c.bf16 %v517_v63, %v517_v63 }
 0x1cc   :  { %597 = vst.msk [vmem:[%s974_s5 + $0x30] sm:$0xf] %vm584_vm2, %v643_v0  ;;  %v644_v3 = vpack.c.bf16 %v509_v1, %v509_v1 }
 0x1cd   :  { %600 = vst.msk [vmem:[%s974_s5 + $0x3c] sm:$0xf] %vm584_vm2, %v646_v2 }
 0x1ce   :  { %598 = vst.msk [vmem:[%s974_s5 + $0x34] sm:$0xf] %vm584_vm2, %v644_v3 }

// kernel: graph_detr_forward.4
= control target key start
LH: loop header
LB: loop body
LE: loop exit
PB: predicated region body
PF: predicated region fallthrough
CT: control target
= control target key end

     0   :  { %s1619_s21 = smov 0   ;;  %s1621_s22 = smov 0   ;;  %s1812_s0 = inlined_call_operand.vmem [shape: f32[8,32], index: 0, kind: input, shape index: {}]   ;;  %s1813_s1 = inlined_call_operand.vmem [shape: bf16[2,64,32], index: 1, kind: input, shape index: {}]   ;;  %s1814_s2 = inlined_call_operand.vmem [shape: bf16[2,64,32], index: 2, kind: input, shape index: {}]   ;;  %s1815_s3 = inlined_call_operand.vmem [shape: f32[2,1,64], index: 3, kind: input, shape index: {}]   ;;  %s1816_s4 = inlined_call_operand.vmem [shape: bf16[3,32,32], index: 4, kind: input, shape index: {}]   ;;  %s1817_s5 = inlined_call_operand.vmem [shape: f32[3,1,32], index: 5, kind: input, shape index: {}]   ;;  %s1818_s6 = inlined_call_operand.vmem [shape: bf16[3,32,32], index: 6, kind: input, shape index: {}]   ;;  %s1819_s7 = inlined_call_operand.vmem [shape: f32[3,1,32], index: 7, kind: input, shape index: {}]   ;;  %s1820_s8 = inlined_call_operand.vmem [shape: bf16[3,32,32], index: 8, kind: input, shape index: {}]   ;;  %s1821_s9 = inlined_call_operand.vmem [shape: f32[3,1,32], index: 9, kind: input, shape index: {}]   ;;  %s1822_s10 = inlined_call_operand.vmem [shape: bf16[3,32,32], index: 10, kind: input, shape index: {}]   ;;  %s1823_s11 = inlined_call_operand.vmem [shape: f32[3,1,32], index: 11, kind: input, shape index: {}]   ;;  %s1824_s12 = inlined_call_operand.vmem [shape: bf16[1,2,8,32], index: 12, kind: output, shape index: {}]  }
   0x1   :  { %1828 = sst [smem:[#allocation8_spill]] %s1812_s0  ;;  %s1623_s23 = smov 0  }
   0x2   :  { %1829 = sst [smem:[#allocation9_spill]] %s1813_s1  ;;  %s1625_s24 = smov 0  }
   0x3   :  { %1830 = sst [smem:[#allocation10_spill]] %s1814_s2  ;;  %s1627_s25 = smov 0  }
   0x4   :  { %1831 = sst [smem:[#allocation11_spill]] %s1816_s4 }
   0x5   :  { %1832 = sst [smem:[#allocation12_spill]] %s1818_s6 }
   0x6 LB: > { %1833 = sst [smem:[#allocation3_spill]] %s1541_s23  ;;  %s31_s26 = sadd.s32 1, %s1541_s23  ;;  %s1549_s25 = sphi %s1627_s25, %s22_s25   ;;  %s1545_s24 = sphi %s1625_s24, %s1850_s24   ;;  %s1541_s23 = sphi %s1623_s23, %s1849_s23   ;;  %s1537_s22 = sphi %s1621_s22, %s1848_s22   ;;  %s1533_s21 = sphi %s1619_s21, %s1847_s21  }
   0x7   : > { %1834 = sst [smem:[#allocation4_spill]] %s1545_s24  ;;  %s34_s27 = sadd.s32 1, %s1545_s24 }
   0x8   : > { %1835 = sst [smem:[#allocation5_spill]] %s1549_s25  ;;  %p32_p0 = scmp.ge.s32.totalorder %s31_s26, 3 }
   0x9   : > { %p1300_p1 = scmp.ge.s32.totalorder %s1549_s25, 1  ;;  %p464_p2 = scmp.lt.s32.totalorder %s1549_s25, 7 }
   0xa   : > { %s1852_s26 = smov (%p32_p0, %s31_s26), 0  ;;  %s1854_s27 = smov (!%p32_p0, %s34_s27), %s1545_s24 }
   0xb   : > { %1836 = sst [smem:[#allocation6_spill]] %s1852_s26  ;;  %p465_p3 = pnand %p1300_p1, %p464_p2 }
   0xc   : > { %p36_p4 = scmp.ge.s32.totalorder %s1854_s27, 2  ;;  %p545_p5 = scmp.lt.s32.totalorder (!%p465_p3), %s1537_s22, 1 }
   0xd   : > { %468 = sbr.rel (%p465_p3) target bundleno = 1098 (0x44a), region = 68  ;;  %p558_p6 = scmp.lt.s32.totalorder (!%p465_p3), %s1533_s21, 2 }
   0xe   : > { %s1856_s27 = smov (%p36_p4, %s1854_s27), 0  ;;  %s1838_s1 = sld [smem:[#allocation9_spill]] (!%p465_p3) }
   0xf   : > { %1837 = sst [smem:[#allocation7_spill]] %s1856_s27  ;;  %s1839_s2 = sld [smem:[#allocation10_spill]] (!%p465_p3) }
  0x10   : > { %s1840_s4 = sld [smem:[#allocation11_spill]] (!%p465_p3)  ;;  %s1841_s6 = sld [smem:[#allocation12_spill]] (!%p465_p3) }
  0x11   : > { %p1314_p7 = scmp.ne.s32.totalorder (!%p465_p3), %s1533_s21, 0 }
  0x14   : > { %s1858_s22 = smov (!%p545_p5, %s1537_s22), 1  ;;  %vm599_vm0 = vcmask (!%p1314_p7), 261120   ;;  %v1551_v0 = vmov (!%p1314_p7), 0.0  }
  0x15   : > { %s1655_s28 = scalar_select %p558_p6, %s1533_s21, 2 }
  0x16   : > { %s1350_s29 = sshll.u32 %s1858_s22, 5  ;;  %598 = sbr.rel (%p1314_p7) target bundleno = 29 (0x1d), region = 72  ;;  %600 = vst.msk [vmem:[#allocation2] sm:$0xff] (!%p1314_p7), %vm599_vm0, %v1551_v0 }
  0x17   : > { %s1665_s17 = scalar_lea.vmem %s1838_s1, %s1350_s29  ;;  %s1670_s20 = scalar_lea.vmem %s1839_s2, %s1350_s29 }
  0x18   : > { %s1352_s27 = sshll.u32 %s1655_s28, 4  ;;  %s581_s23 = scalar_lea.vmem %s1821_s9, %s1655_s28 }
  0x19   : > { %s1680_s30 = scalar_lea.vmem %s1840_s4, %s1352_s27  ;;  %s570_s15 = scalar_lea.vmem %s1841_s6, %s1352_s27 }
  0x1a   : > { %s1692_s2 = scalar_lea.vmem %s1820_s8, %s1352_s27  ;;  %s1701_s4 = scalar_lea.vmem %s1822_s10, %s1352_s27 }
  0x1b   : > { %s589_s6 = scalar_lea.vmem %s1823_s11, %s1655_s28  ;;  %s1313_s1 = sshll.u32 %s1858_s22, 2 }
  0x1c   : > { %s1711_s29 = scalar_lea.vmem %s1824_s12, %s1313_s1 }
  0x1d PF: > { %v1491_v1 = vld [vmem:[%s570_s15] sm:$0xff]   ;;  %vm628_vm1 = vcmask 261120   ;;  %v1492_v2 = vld [vmem:[%s570_s15 + $0x8] sm:$0xff]   ;;  %v1552_v4 = vmov 0.0   ;;  %vm1553_vm2 = vmmov 0   ;;  %v1495_v6 = vld [vmem:[%s1670_s20 + $0x10] sm:$0xff]   ;;  %s1844_s19 = scalar_lea.vmem %s1817_s5, %s1655_s28  ;;  %s1845_s25 = scalar_lea.vmem %s1815_s3, %s1858_s22 }
  0x1e   : > { %1392 = vmatprep.subr.bf16.mxu1 %v1491_v1  ;;  %v1493_v3 = vld [vmem:[%s1670_s20] sm:$0xff]   ;;  %1384 = vmatprep.subr.bf16.mxu0 %v1552_v4  ;;  %v1494_v5 = vld [vmem:[%s1670_s20 + $0x8] sm:$0xff]   ;;  %s1842_s15 = sld [smem:[#allocation8_spill]]  ;;  %v1496_v13 = vld [vmem:[%s1670_s20 + $0x18] sm:$0xff]   ;;  %vm995_vm3 = vcmask 523264   ;;  %vm1125_vm4 = vcmask 257024  }
  0x1f   : > { %1393 = vmatpush3.bf16.msra.mxu1 %v1491_v1  ;;  %1388 = vmatprep.mubr.msk.bf16.mxu0 %vm1553_vm2, %v1552_v4  ;;  %v1497_v7 = vld [vmem:[%s1680_s30] sm:$0xff]   ;;  %v1498_v8 = vld [vmem:[%s1680_s30 + $0x8] sm:$0xff]   ;;  %v1503_v18 = vld [vmem:[%s1665_s17 + $0x10] sm:$0xff]   ;;  %s1843_s30 = scalar_lea.vmem %s1819_s7, %s1655_s28 }
  0x20   : > { %1394 = vmatprep.subr.bf16.mxu1 %v1492_v2  ;;  %1396 = vmatprep.mubr.msk.bf16.mxu1 %vm628_vm1, %v1493_v3  ;;  %v1723_v9 = vld [vmem:[#allocation2] sm:$0xff]  ;;  %v1500_v15 = vld [vmem:[%s1692_s2 + $0x8] sm:$0xff]   ;;  %v1504_v19 = vld [vmem:[%s1665_s17 + $0x18] sm:$0xff]  }
  0x21   : > { %1385 = vmatpush3.bf16.msra.mxu0 %v1497_v7  ;;  %v1499_v14 = vld [vmem:[%s1692_s2] sm:$0xff]   ;;  %v1502_v17 = vld [vmem:[%s1665_s17 + $0x8] sm:$0xff]  }
  0x22   : > { %1386 = vmatprep.subr.bf16.mxu0 %v1552_v4  ;;  %v1501_v16 = vld [vmem:[%s1665_s17] sm:$0xff]  }
  0x23   : > { %1395 = vmatpush3.bf16.msra.mxu1 %v1492_v2  ;;  %v1319_v21 = vld [vmem:[%s1843_s30] ss:$0 sm:$0xff] }
  0x24   : > { %v602_v10 = vld [vmem:[%s1842_s15] sm:$0xff]  ;;  %1416 = vmatprep.subr.bf16.mxu1 %v1552_v4 }
  0x25   : > { %v603_v11 = vadd.f32 %v602_v10, %v1723_v9  ;;  %1387 = vmatpush3.bf16.msra.mxu0 %v1498_v8  ;;  %v1315_v48 = vld [vmem:[%s1844_s19] ss:$0 sm:$0xff] }
  0x26   : > { %1397 = vmatmul.mubr.msk.bf16.vlgmr.msra.gmra.mrb[0].mxu1 %vm628_vm1, %v1494_v5  ;;  %1404 = vmatprep.subr.bf16.mxu0 %v1499_v14  ;;  %v1330_v52 = vld [vmem:[%s581_s23] ss:$0 sm:$0xff] }
  0x27   : > { %1400 = vmatprep.mubr.msk.bf16.mxu1 %vm628_vm1, %v1495_v6  ;;  %v604_v12 = vpack.c.bf16 %v603_v11, %v603_v11  ;;  %v1341_v11 = vld [vmem:[%s1845_s25] ss:$0 sm:$0xff] }
  0x29   : > { %1389 = vmatmul.mubr.msk.bf16.vlgmr.msra.gmra.mrb[0].mxu0 %vm628_vm1, %v604_v12 }
  0x2a   : > { %1408 = vmatprep.mubr.msk.bf16.mxu0 %vm628_vm1, %v1501_v16  ;;  %1405 = vmatpush3.bf16.msra.mxu0 %v1499_v14 }
  0x2b   : > { %1406 = vmatprep.subr.bf16.mxu0 %v1500_v15 }
  0x2e   : > { %1401 = vmatmul.mubr.msk.bf16.gmra.mrb[4].mxu1 %vm628_vm1, %v1496_v13  ;;  %1407 = vmatpush3.bf16.msra.mxu0 %v1500_v15 }
  0x2f   : > { %1424 = vmatprep.mubr.msk.bf16.mxu1 %vm1553_vm2, %v1552_v4  ;;  %1428 = vmatprep.subr.bf16.mxu0 %v1552_v4 }
  0x31   : > { %1409 = vmatmul.mubr.msk.bf16.vlgmr.msra.gmra.mrb[4].mxu0 %vm628_vm1, %v1502_v17 }
  0x32   : > { %1412 = vmatprep.mubr.msk.bf16.mxu0 %vm628_vm1, %v1503_v18 }
  0x39   : > { %1413 = vmatmul.mubr.msk.bf16.gmra.mrb[8].mxu0 %vm628_vm1, %v1504_v19 }
  0x3a   : > { %1436 = vmatprep.mubr.msk.bf16.mxu0 %vm1553_vm2, %v1552_v4 }
  0xf9   : > { %v1398_v20 = vpop.f32.mrb[0].mxu1 }
  0xfa   : > { %v769_v22 = vpop.f32.mrb[1].mxu1  ;;  %v778_v24 = vadd.f32 %v1398_v20, %v1319_v21 }
  0xfb   : > { %v1399_v23 = vpop.f32.mrb[2].mxu1  ;;  %v770_v27 = vadd.f32 %v1319_v21, %v769_v22 }
  0xfc   : > { %v781_v25 = vadd.f32 %v1399_v23, %v1319_v21  ;;  %v772_v26 = vpop.f32.mrb[3].mxu1  ;;  %v666_v30 = vpop.f32.mrb[0].mxu0 }
  0xfd   : > { %v773_v28 = vadd.f32 %v1319_v21, %v772_v26  ;;  %v1390_v32 = vpop.f32.mrb[1].mxu0  ;;  %v667_v49 = vadd.f32 %v1315_v48, %v666_v30 }
  0xfe   : > { %v930_v29 = vpack.c.bf16 %v781_v25, %v778_v24  ;;  %v669_v33 = vpop.f32.mrb[2].mxu0  ;;  %v1505_v24 = vld [vmem:[%s1701_s4] sm:$0xff]   ;;  %v1506_v25 = vld [vmem:[%s1701_s4 + $0x8] sm:$0xff]  }
  0xff   : > { %v929_v31 = vpack.c.bf16 %v773_v28, %v770_v27  ;;  %v1391_v36 = vpop.f32.mrb[3].mxu0  ;;  %v928_v51 = vpack.c.bf16 %v667_v49, %v667_v49 }
 0x100   : > { %v947_v46 = vsel %vm628_vm1, %v930_v29, 0 }
 0x101   : > { %v944_v34 = vsel %vm628_vm1, %v929_v31, 0  ;;  %v1402_v35 = vpop.f32.mrb[4].mxu1 }
 0x102   : > { %1417 = vmatpush3.bf16.xpose.msra.mxu1 %v944_v34  ;;  %v794_v37 = vadd.f32 %v1402_v35, %v1319_v21  ;;  %v785_v38 = vpop.f32.mrb[5].mxu1  ;;  %v1344_v34 = vld [vmem:[%s589_s6] ss:$0 sm:$0xff] }
 0x103   : > { %v786_v39 = vadd.f32 %v1319_v21, %v785_v38  ;;  %v1403_v40 = vpop.f32.mrb[6].mxu1  ;;  %1418 = vmatprep.subr.bf16.mxu1 %v1552_v4 }
 0x104   : > { %v797_v41 = vadd.f32 %v1403_v40, %v1319_v21  ;;  %v788_v42 = vpop.f32.mrb[7].mxu1  ;;  %v1410_v53 = vpop.f32.mrb[4].mxu0 }
 0x105   : > { %v789_v43 = vadd.f32 %v1319_v21, %v788_v42  ;;  %v906_v54 = vadd.f32 %v1410_v53, %v1330_v52  ;;  %v897_v55 = vpop.f32.mrb[5].mxu0 }
 0x106   : > { %v932_v44 = vpack.c.bf16 %v797_v41, %v794_v37  ;;  %v898_v56 = vadd.f32 %v1330_v52, %v897_v55  ;;  %v1411_v57 = vpop.f32.mrb[6].mxu0 }
 0x107   : > { %v931_v45 = vpack.c.bf16 %v789_v43, %v786_v39  ;;  %v909_v58 = vadd.f32 %v1411_v57, %v1330_v52  ;;  %v900_v59 = vpop.f32.mrb[7].mxu0 }
 0x108   : > { %v953_v50 = vsel %vm628_vm1, %v932_v44, 0  ;;  %v901_v60 = vadd.f32 %v1330_v52, %v900_v59 }
 0x109   : > { %v950_v47 = vsel %vm628_vm1, %v931_v45, 0  ;;  %v1007_v61 = vpack.c.bf16 %v909_v58, %v906_v54 }
 0x10a   : > { %1419 = vmatpush3.bf16.xpose.msra.mxu1 %v947_v46  ;;  %v1006_v62 = vpack.c.bf16 %v901_v60, %v898_v56 }
 0x10b   : > { %1420 = vmatprep.subr.bf16.mxu1 %v1552_v4 }
 0x10c   : > { %v1414_v63 = vpop.f32.mrb[8].mxu0  ;;  %1429 = vmatpush3.bf16.msra.mxu0 %v1006_v62 }
 0x10d   : > { %v922_v0 = vadd.f32 %v1414_v63, %v1330_v52  ;;  %v913_v1 = vpop.f32.mrb[9].mxu0  ;;  %1430 = vmatprep.subr.bf16.mxu0 %v1552_v4 }
 0x10e   : > { %v914_v2 = vadd.f32 %v1330_v52, %v913_v1  ;;  %v1415_v3 = vpop.f32.mrb[10].mxu0 }
 0x10f   : > { %v925_v5 = vadd.f32 %v1415_v3, %v1330_v52  ;;  %v916_v6 = vpop.f32.mrb[11].mxu0 }
 0x110   : > { %v917_v7 = vadd.f32 %v1330_v52, %v916_v6  ;;  %1431 = vmatpush3.bf16.msra.mxu0 %v1007_v61 }
 0x111   : > { %v1009_v8 = vpack.c.bf16 %v925_v5, %v922_v0  ;;  %1432 = vmatprep.subr.bf16.mxu0 %v1552_v4 }
 0x112   : > { %1421 = vmatpush3.bf16.xpose.msra.mxu1 %v950_v47  ;;  %v1008_v10 = vpack.c.bf16 %v917_v7, %v914_v2 }
 0x113   : > { %1422 = vmatprep.subr.bf16.mxu1 %v1552_v4 }
 0x114   : > { %1433 = vmatpush3.bf16.msra.mxu0 %v1008_v10 }
 0x115   : > { %1434 = vmatprep.subr.bf16.mxu0 %v1552_v4 }
 0x118   : > { %1435 = vmatpush3.bf16.msra.mxu0 %v1009_v8 }
 0x119   : > { %1440 = vmatprep.subr.bf16.mxu0 %v1552_v4 }
 0x11a   : > { %1423 = vmatpush3.bf16.xpose.msra.mxu1 %v953_v50 }
 0x121   : > { %1425 = vmatmul.mubr.msk.bf16.vlgmr.msra.gmra.mrb[8].mxu1 %vm628_vm1, %v928_v51 }
 0x1f4   : > { %v989_v12 = vpop.f32.mrb[8].mxu1 }
 0x1f5   : > { %v990_v13 = vadd.f32 %v1341_v11, %v989_v12  ;;  %v1426_v14 = vpop.f32.mrb[9].mxu1 }
 0x1f6   : > { %v992_v15 = vpop.f32.mrb[10].mxu1 }
 0x1f7   : > { %v1427_v16 = vpop.f32.mrb[11].mxu1  ;;  %v996_v17 = vsel %vm995_vm3, %v990_v13, -inf }
 0x1f8   : > { %997 = vmax.xlane.f32.xlu0 %v996_v17 }
 0x285   : > { %v998_v18 = vpop.xlane.xlu0 %997 }
 0x286   : > { %v999_v19 = vsub.f32 %v990_v13, %v998_v18 }
 0x288   : > { %v1000_v20 = vmul.f32 1.442695, %v999_v19 }
 0x28a   : > { %1507 = vpow2.f32 %v1000_v20 }
 0x294   : > { %v1508_v21 = vpop.eup %1507 }
 0x295   : > { %v1005_v22 = vpack.c.bf16 %v1508_v21, %v1508_v21  ;;  %v1002_v23 = vsel %vm995_vm3, %v1508_v21, 0.0 }
 0x296   : > { %1003 = vadd.xlane.f32.xlu0 %v1002_v23 }
 0x297   : > { %1437 = vmatmul.mubr.msk.bf16.vlgmr.msra.gmra.mrb[12].mxu0 %vm995_vm3, %v1005_v22 }
 0x298   : > { %1444 = vmatprep.mubr.msk.bf16.mxu0 %vm1553_vm2, %v1552_v4  ;;  %1441 = vmatpush3.bf16.msra.mxu0 %v1505_v24 }
 0x299   : > { %1442 = vmatprep.subr.bf16.mxu0 %v1552_v4 }
 0x29c   : > { %1443 = vmatpush3.bf16.msra.mxu0 %v1506_v25 }
 0x323   : > { %v1004_v26 = vpop.xlane.xlu0 %1003 }
 0x324   : > { %1509 = vrcp.f32 %v1004_v26 }
 0x32e   : > { %v1510_v27 = vpop.eup %1509 }
 0x36a   : > { %v1047_v28 = vpop.f32.mrb[12].mxu0 }
 0x36b   : > { %v1054_v29 = vmul.f32 %v1510_v27, %v1047_v28  ;;  %v1438_v30 = vpop.f32.mrb[13].mxu0 }
 0x36c   : > { %v1050_v31 = vpop.f32.mrb[14].mxu0 }
 0x36d   : > { %v1055_v32 = vpack.c.bf16 %v1054_v29, %v1054_v29  ;;  %v1439_v33 = vpop.f32.mrb[15].mxu0 }
 0x36f   : > { %1445 = vmatmul.mubr.msk.bf16.vlgmr.msra.gmra.mrb[16].mxu0 %vm628_vm1, %v1055_v32 }
 0x442   : > { %v1116_v4 = vpop.f32.mrb[16].mxu0 }
 0x443   : > { %v1117_v35 = vadd.f32 %v1344_v34, %v1116_v4  ;;  %v1446_v36 = vpop.f32.mrb[17].mxu0 }
 0x444   : > { %v1119_v37 = vpop.f32.mrb[18].mxu0 }
 0x445   : > { %v1122_v38 = vadd.f32 %v1117_v35, %v1723_v9  ;;  %v1447_v39 = vpop.f32.mrb[19].mxu0 }
 0x447   : > { %1123 = vst.msk [vmem:[#allocation2] sm:$0xff] %vm628_vm1, %v1122_v38  ;;  %v1124_v40 = vpack.c.bf16 %v1122_v38, %v1122_v38 }
 0x449   : > { %1126 = vst.msk [vmem:[%s1711_s29] sm:$0xf] %vm1125_vm4, %v1124_v40 }
 0x44a PF: > { %s1846_s4 = sld [smem:[#allocation5_spill]]  ;;  %s1847_s21 = sld [smem:[#allocation3_spill]] }
 0x44b   : > { %s1848_s22 = sld [smem:[#allocation4_spill]]  ;;  %s1849_s23 = sld [smem:[#allocation6_spill]] }
 0x44c   : > { %s1850_s24 = sld [smem:[#allocation7_spill]] }
 0x450   : > { %s22_s25 = sadd.s32 1, %s1846_s4  }
 0x451   : > { %p19_p8 = scmp.ge.s32.totalorder %s22_s25, 8  }
 0x453   :  { %21 = sbr.rel (!%p19_p8) target bundleno = 6 (0x6), region = 132 }

</bundles_post_ra>
